<compile_context>
chip_gen: v7x
topology: tpu7x:2x2x1
jax: 0.10.0
libtpu: 0.0.40
codegen_flags: <defaults>
</compile_context>

<pallas_src>
import functools

import jax
import jax.numpy as jnp
from jax.experimental import pallas as pl
from jax.experimental.pallas import tpu as pltpu


def upconv2x_kernel(xm_ref, xt_ref, xb_ref, w_ref, b_ref, o_ref):
    """Fused nearest-2x-upsample + 3x3 conv (pad=1, bias) on one row tile.

    xm_ref: (1, TH, W+2, C_in)  W-padded original-resolution rows of this tile
    xt_ref: (1, 1,  W+2, C_in)  row just above the tile (clamped; zeroed at the top edge)
    xb_ref: (1, 1,  W+2, C_in)  row just below the tile (clamped; zeroed at the bottom edge)
    w_ref:  (4, 4*C_in, C_out)  parity-folded 2x2 kernels, parity p = 2*py + px
    b_ref:  (1, C_out)          bias (f32)
    o_ref:  (1, TH*W, 4*C_out)  parity-major output for this tile
    """
    _, TH, Wp, C_in = xm_ref.shape
    W = Wp - 2
    dt = xm_ref.dtype

    r = pl.program_id(1)
    last = pl.num_programs(1) - 1

    # Vertical conv padding (padding=1, at ORIGINAL resolution): halo rows come from clamped
    # index maps and are zeroed here at the image edges.  Horizontal zero padding was folded
    # into the W+2 input columns by the wrapper.
    top = xt_ref[0] * (r > 0).astype(dt)          # (1, W+2, C_in)
    bot = xb_ref[0] * (r < last).astype(dt)       # (1, W+2, C_in)
    xpad = jnp.concatenate([top, xm_ref[0], bot], axis=0)     # (TH+2, W+2, C_in)

    # 9 shifted taps at original resolution, flattened to (TH*W, C_in).
    taps = [[xpad[a:a + TH, b:b + W, :].reshape(TH * W, C_in) for b in range(3)]
            for a in range(3)]

    bias = b_ref[...]                              # (1, C_out), f32
    outs = []
    for py in range(2):
        for px in range(2):
            p = 2 * py + px
            # Output pixels of parity (py, px) on the 2x-upsampled image only see a 2x2 window
            # of original pixels: one MAC-optimal K = 4*C_in matmul per parity.
            patch = jnp.concatenate(
                [taps[py][px], taps[py][px + 1],
                 taps[py + 1][px], taps[py + 1][px + 1]], axis=1)   # (TH*W, 4*C_in)
            acc = jnp.dot(patch, w_ref[p],
                          preferred_element_type=jnp.float32)       # (TH*W, C_out)
            outs.append(acc + bias)

    # One contiguous parity-major slab per step.
    o_ref[...] = jnp.concatenate(outs, axis=1)[None].astype(o_ref.dtype)


def _fold_weight(weight):
    """(C_out, C_in, 3, 3) -> (4, 4*C_in, C_out) parity-folded 2x2 kernels."""
    C_out, C_in = weight.shape[0], weight.shape[1]
    w_t = jnp.transpose(weight, (2, 3, 1, 0))          # (ky, kx, C_in, C_out)
    w_fold = jnp.zeros((2, 2, 2, 2, C_in, C_out), weight.dtype)
    for py in range(2):
        for ky in range(3):
            a = (py - 1 + ky) // 2 + 1 - py            # which of the 2 window rows this tap reads
            for px in range(2):
                for kx in range(3):
                    b = (px - 1 + kx) // 2 + 1 - px
                    w_fold = w_fold.at[py, px, a, b].add(w_t[ky, kx])
    # (py, px, a, b, i, o) -> (p, (a*2+b)*C_in + i, o) -- matches the in-kernel patch order.
    return w_fold.reshape(4, 4 * C_in, C_out)


def _pick_row_tile(H, W, C_in, C_out, itemsize):
    """Largest divisor of H whose double-buffered in+out blocks stay well under VMEM."""
    budget = 8 << 20                                   # conservative: fits v7x's 64 MiB VMEM
    for th in range(min(H, 512), 0, -1):
        if H % th or (th * W) % 8:
            continue
        in_blk = (th + 2) * (W + 2) * C_in * itemsize  # main rows + halos
        out_blk = th * W * 4 * C_out * itemsize
        if 2 * (in_blk + out_blk) <= budget:
            return th
    return H


@functools.partial(jax.jit, static_argnames=("row_tile",))
def upsampling_forward(x_nchw, weight, bias, row_tile=None):
    """UpSampling.forward: nearest 2x upsample then Conv2d(C_in, C_out, 3, 1, 1, bias=True)."""
    N, C_in, H, W = x_nchw.shape
    C_out = weight.shape[0]
    dt = x_nchw.dtype

    TH = row_tile if row_tile is not None else _pick_row_tile(
        H, W, C_in, C_out, x_nchw.dtype.itemsize)
    assert H % TH == 0 and ((TH * W) % 8 == 0 or TH == H), (TH, H, W)
    R = H // TH

    w_k = _fold_weight(weight).astype(dt)              # (4, 4*C_in, C_out)
    b_k = bias.reshape(1, C_out).astype(jnp.float32)

    # Only original-resolution glue: NCHW -> NHWC with the conv's horizontal zero padding folded
    # into the same (small) XLA pass.
    x_nhwc = jnp.pad(jnp.transpose(x_nchw, (0, 2, 3, 1)),
                     ((0, 0), (0, 0), (1, 1), (0, 0)))  # (N, H, W+2, C_in)

    flops = 2 * N * H * W * 16 * C_in * C_out
    bytes_accessed = (x_nhwc.size + w_k.size + N * H * W * 4 * C_out) * x_nhwc.dtype.itemsize

    out_flat = pl.pallas_call(
        upconv2x_kernel,
        out_shape=jax.ShapeDtypeStruct((N, H * W, 4 * C_out), dt),
        grid_spec=pltpu.PrefetchScalarGridSpec(
            num_scalar_prefetch=0,
            grid=(N, R),
            in_specs=[
                # main rows of this tile (W already zero-padded)
                pl.BlockSpec((1, TH, W + 2, C_in), lambda n, r: (n, r, 0, 0)),
                # 1-row halos (block size 1 on H -> block index == row index), clamped at edges
                pl.BlockSpec((1, 1, W + 2, C_in),
                             lambda n, r: (n, jnp.maximum(r * TH - 1, 0), 0, 0)),
                pl.BlockSpec((1, 1, W + 2, C_in),
                             lambda n, r: (n, jnp.minimum(r * TH + TH, H - 1), 0, 0)),
                # folded weights / bias stay VMEM-resident (constant index_map)
                pl.BlockSpec((4, 4 * C_in, C_out), lambda n, r: (0, 0, 0)),
                pl.BlockSpec((1, C_out), lambda n, r: (0, 0)),
            ],
            out_specs=pl.BlockSpec((1, TH * W, 4 * C_out), lambda n, r: (n, r, 0)),
        ),
        compiler_params=pltpu.CompilerParams(
            dimension_semantics=("parallel", "parallel"),
            vmem_limit_bytes=32 * 1024 * 1024,
        ),
        cost_estimate=pl.CostEstimate(flops=flops, transcendentals=0,
                                      bytes_accessed=bytes_accessed),
    )(x_nhwc, x_nhwc, x_nhwc, w_k, b_k)

    # Parity de-interleave + NCHW layout in a single transpose pass over the output.
    out = out_flat.reshape(N, H, W, 2, 2, C_out)            # (n, i, j, py, px, o)
    out = jnp.transpose(out, (0, 5, 1, 3, 2, 4))            # (n, o, i, py, j, px)
    return out.reshape(N, C_out, 2 * H, 2 * W)


def reference_forward(x_nchw, weight, bias):
    """Pure-JAX reference matching the PyTorch module."""
    x_up = jnp.repeat(jnp.repeat(x_nchw, 2, axis=2), 2, axis=3)
    out = jax.lax.conv_general_dilated(
        x_up, weight, window_strides=(1, 1), padding=((1, 1), (1, 1)),
        dimension_numbers=("NCHW", "OIHW", "NCHW"))
    return out + bias[None, :, None, None]


def _make_problem(key, N, C_in, C_out, H, W):
    kx, kw, kb = jax.random.split(key, 3)
    x = jax.random.normal(kx, (N, C_in, H, W), dtype=jnp.float32)
    fan_in = C_in * 3 * 3
    bound = 1.0 / (fan_in ** 0.5)
    weight = jax.random.uniform(kw, (C_out, C_in, 3, 3), jnp.float32, -bound, bound)
    bias = jax.random.uniform(kb, (C_out,), jnp.float32, -bound, bound)
    return x, weight, bias


if __name__ == "__main__":
    key = jax.random.PRNGKey(0)
    k1, k2 = jax.random.split(key)

    # Case 1: N=2, C_in=4, C_out=8, 16x16 (output 2x8x32x32).  row_tile=8 exercises the
    # multi-tile path (both halo directions); None uses the auto tiler (single tile).
    x, weight, bias = _make_problem(k1, 2, 4, 8, 16, 16)
    ref = jax.block_until_ready(reference_forward(x, weight, bias))
    for rt in (8, None):
        out = jax.block_until_ready(upsampling_forward(x, weight, bias, row_tile=rt))
        assert out.shape == (2, 8, 32, 32), out.shape
        err = float(jnp.abs(out - ref).max())
        assert jnp.allclose(out, ref, atol=1e-5, rtol=1e-5), (rt, err)

    # Case 2: N=1, C_in=8, C_out=32, 8x32 — exercises the lane-dense (4*C_out = 128) store path.
    x2, w2, b2 = _make_problem(k2, 1, 8, 32, 8, 32)
    ref2 = jax.block_until_ready(reference_forward(x2, w2, b2))
    out2 = jax.block_until_ready(upsampling_forward(x2, w2, b2))
    assert out2.shape == (1, 32, 16, 64), out2.shape
    err2 = float(jnp.abs(out2 - ref2).max())
    assert jnp.allclose(out2, ref2, atol=1e-5, rtol=1e-5), err2

    print("KERNEL_OK")
</pallas_src>

<mosaic_0001>
module attributes {stable_mosaic.version = 11 : i64} {
  func.func @upconv2x_kernel(%arg0: i32, %arg1: i32, %arg2: memref<1x8x18x4xf32, #tpu.memory_space<vmem>>, %arg3: memref<1x1x18x4xf32, #tpu.memory_space<vmem>>, %arg4: memref<1x1x18x4xf32, #tpu.memory_space<vmem>>, %arg5: memref<4x16x8xf32, #tpu.memory_space<vmem>>, %arg6: memref<1x8xf32, #tpu.memory_space<vmem>>, %arg7: memref<1x128x32xf32, #tpu.memory_space<vmem>>) attributes {dimension_semantics = [#tpu.dimension_semantics<parallel>, #tpu.dimension_semantics<parallel>], iteration_bounds = array<i64: 2, 2>, scalar_prefetch = 0 : i64, scratch_operands = 0 : i64, tpu.core_type = #tpu.core_type<tc>, window_params = [{transform_indices = @transform_0, window_bounds = array<i64: 1, 8, 18, 4>}, {transform_indices = @transform_1, window_bounds = array<i64: 1, 1, 18, 4>}, {transform_indices = @transform_2, window_bounds = array<i64: 1, 1, 18, 4>}, {pipeline_mode = #tpu.pipeline_mode<synchronous>, transform_indices = @transform_3, window_bounds = array<i64: 4, 16, 8>}, {pipeline_mode = #tpu.pipeline_mode<synchronous>, transform_indices = @transform_4, window_bounds = array<i64: 1, 8>}, {transform_indices = @transform_5, window_bounds = array<i64: 1, 128, 32>}]} {
    %c0 = arith.constant 0 : index
    %c0_0 = arith.constant 0 : index
    %c0_1 = arith.constant 0 : index
    %c0_2 = arith.constant 0 : index
    %0 = vector.load %arg3[%c0, %c0_0, %c0_1, %c0_2] : memref<1x1x18x4xf32, #tpu.memory_space<vmem>>, vector<1x1x18x4xf32>
    %1 = vector.shape_cast %0 : vector<1x1x18x4xf32> to vector<1x18x4xf32>
    %c0_i32 = arith.constant 0 : i32
    %2 = arith.cmpi sgt, %arg1, %c0_i32 : i32
    %3 = arith.extui %2 : i1 to i32
    %4 = arith.sitofp %3 : i32 to f32
    %5 = vector.broadcast %4 : f32 to vector<1x18x4xf32>
    %6 = arith.mulf %1, %5 : vector<1x18x4xf32>
    %c0_3 = arith.constant 0 : index
    %c0_4 = arith.constant 0 : index
    %c0_5 = arith.constant 0 : index
    %c0_6 = arith.constant 0 : index
    %7 = vector.load %arg4[%c0_3, %c0_4, %c0_5, %c0_6] : memref<1x1x18x4xf32, #tpu.memory_space<vmem>>, vector<1x1x18x4xf32>
    %8 = vector.shape_cast %7 : vector<1x1x18x4xf32> to vector<1x18x4xf32>
    %c1_i32 = arith.constant 1 : i32
    %9 = arith.cmpi slt, %arg1, %c1_i32 : i32
    %10 = arith.extui %9 : i1 to i32
    %11 = arith.sitofp %10 : i32 to f32
    %12 = vector.broadcast %11 : f32 to vector<1x18x4xf32>
    %13 = arith.mulf %8, %12 : vector<1x18x4xf32>
    %c0_7 = arith.constant 0 : index
    %c0_8 = arith.constant 0 : index
    %c0_9 = arith.constant 0 : index
    %c0_10 = arith.constant 0 : index
    %14 = vector.load %arg2[%c0_7, %c0_8, %c0_9, %c0_10] : memref<1x8x18x4xf32, #tpu.memory_space<vmem>>, vector<1x8x18x4xf32>
    %15 = vector.shape_cast %14 : vector<1x8x18x4xf32> to vector<8x18x4xf32>
    %16 = tpu.concatenate %6, %15, %13 in 0 : vector<1x18x4xf32>, vector<8x18x4xf32>, vector<1x18x4xf32> -> vector<10x18x4xf32>
    %17 = vector.extract_strided_slice %16 {offsets = [0, 0, 0], sizes = [8, 16, 4], strides = [1, 1, 1]} : vector<10x18x4xf32> to vector<8x16x4xf32>
    %18 = vector.shape_cast %17 : vector<8x16x4xf32> to vector<128x4xf32>
    %19 = vector.extract_strided_slice %16 {offsets = [0, 1, 0], sizes = [8, 16, 4], strides = [1, 1, 1]} : vector<10x18x4xf32> to vector<8x16x4xf32>
    %20 = vector.shape_cast %19 : vector<8x16x4xf32> to vector<128x4xf32>
    %21 = vector.extract_strided_slice %16 {offsets = [0, 2, 0], sizes = [8, 16, 4], strides = [1, 1, 1]} : vector<10x18x4xf32> to vector<8x16x4xf32>
    %22 = vector.shape_cast %21 : vector<8x16x4xf32> to vector<128x4xf32>
    %23 = vector.extract_strided_slice %16 {offsets = [1, 0, 0], sizes = [8, 16, 4], strides = [1, 1, 1]} : vector<10x18x4xf32> to vector<8x16x4xf32>
    %24 = vector.shape_cast %23 : vector<8x16x4xf32> to vector<128x4xf32>
    %25 = vector.extract_strided_slice %16 {offsets = [1, 1, 0], sizes = [8, 16, 4], strides = [1, 1, 1]} : vector<10x18x4xf32> to vector<8x16x4xf32>
    %26 = vector.shape_cast %25 : vector<8x16x4xf32> to vector<128x4xf32>
    %27 = vector.extract_strided_slice %16 {offsets = [1, 2, 0], sizes = [8, 16, 4], strides = [1, 1, 1]} : vector<10x18x4xf32> to vector<8x16x4xf32>
    %28 = vector.shape_cast %27 : vector<8x16x4xf32> to vector<128x4xf32>
    %29 = vector.extract_strided_slice %16 {offsets = [2, 0, 0], sizes = [8, 16, 4], strides = [1, 1, 1]} : vector<10x18x4xf32> to vector<8x16x4xf32>
    %30 = vector.shape_cast %29 : vector<8x16x4xf32> to vector<128x4xf32>
    %31 = vector.extract_strided_slice %16 {offsets = [2, 1, 0], sizes = [8, 16, 4], strides = [1, 1, 1]} : vector<10x18x4xf32> to vector<8x16x4xf32>
    %32 = vector.shape_cast %31 : vector<8x16x4xf32> to vector<128x4xf32>
    %33 = vector.extract_strided_slice %16 {offsets = [2, 2, 0], sizes = [8, 16, 4], strides = [1, 1, 1]} : vector<10x18x4xf32> to vector<8x16x4xf32>
    %34 = vector.shape_cast %33 : vector<8x16x4xf32> to vector<128x4xf32>
    %c0_11 = arith.constant 0 : index
    %c0_12 = arith.constant 0 : index
    %35 = vector.load %arg6[%c0_11, %c0_12] : memref<1x8xf32, #tpu.memory_space<vmem>>, vector<1x8xf32>
    %36 = tpu.concatenate %18, %20, %24, %26 in 1 : vector<128x4xf32>, vector<128x4xf32>, vector<128x4xf32>, vector<128x4xf32> -> vector<128x16xf32>
    %c0_13 = arith.constant 0 : index
    %c0_14 = arith.constant 0 : index
    %c0_15 = arith.constant 0 : index
    %37 = vector.load %arg5[%c0_13, %c0_14, %c0_15] : memref<4x16x8xf32, #tpu.memory_space<vmem>>, vector<1x16x8xf32>
    %38 = vector.shape_cast %37 : vector<1x16x8xf32> to vector<16x8xf32>
    %cst = arith.constant dense<0.000000e+00> : vector<128x8xf32>
    %39 = tpu.matmul %36, %38, %cst {dimension_numbers = #tpu.dot_dimension_numbers<[1], [0], [0], [1], [0, 0, 1, 1], [], []>} : vector<128x16xf32>, vector<16x8xf32>, vector<128x8xf32> -> vector<128x8xf32>
    %40 = vector.broadcast %35 : vector<1x8xf32> to vector<128x8xf32>
    %41 = arith.addf %39, %40 : vector<128x8xf32>
    %42 = tpu.concatenate %20, %22, %26, %28 in 1 : vector<128x4xf32>, vector<128x4xf32>, vector<128x4xf32>, vector<128x4xf32> -> vector<128x16xf32>
    %c1 = arith.constant 1 : index
    %c0_16 = arith.constant 0 : index
    %c0_17 = arith.constant 0 : index
    %43 = vector.load %arg5[%c1, %c0_16, %c0_17] : memref<4x16x8xf32, #tpu.memory_space<vmem>>, vector<1x16x8xf32>
    %44 = vector.shape_cast %43 : vector<1x16x8xf32> to vector<16x8xf32>
    %cst_18 = arith.constant dense<0.000000e+00> : vector<128x8xf32>
    %45 = tpu.matmul %42, %44, %cst_18 {dimension_numbers = #tpu.dot_dimension_numbers<[1], [0], [0], [1], [0, 0, 1, 1], [], []>} : vector<128x16xf32>, vector<16x8xf32>, vector<128x8xf32> -> vector<128x8xf32>
    %46 = vector.broadcast %35 : vector<1x8xf32> to vector<128x8xf32>
    %47 = arith.addf %45, %46 : vector<128x8xf32>
    %48 = tpu.concatenate %24, %26, %30, %32 in 1 : vector<128x4xf32>, vector<128x4xf32>, vector<128x4xf32>, vector<128x4xf32> -> vector<128x16xf32>
    %c2 = arith.constant 2 : index
    %c0_19 = arith.constant 0 : index
    %c0_20 = arith.constant 0 : index
    %49 = vector.load %arg5[%c2, %c0_19, %c0_20] : memref<4x16x8xf32, #tpu.memory_space<vmem>>, vector<1x16x8xf32>
    %50 = vector.shape_cast %49 : vector<1x16x8xf32> to vector<16x8xf32>
    %cst_21 = arith.constant dense<0.000000e+00> : vector<128x8xf32>
    %51 = tpu.matmul %48, %50, %cst_21 {dimension_numbers = #tpu.dot_dimension_numbers<[1], [0], [0], [1], [0, 0, 1, 1], [], []>} : vector<128x16xf32>, vector<16x8xf32>, vector<128x8xf32> -> vector<128x8xf32>
    %52 = vector.broadcast %35 : vector<1x8xf32> to vector<128x8xf32>
    %53 = arith.addf %51, %52 : vector<128x8xf32>
    %54 = tpu.concatenate %26, %28, %32, %34 in 1 : vector<128x4xf32>, vector<128x4xf32>, vector<128x4xf32>, vector<128x4xf32> -> vector<128x16xf32>
    %c3 = arith.constant 3 : index
    %c0_22 = arith.constant 0 : index
    %c0_23 = arith.constant 0 : index
    %55 = vector.load %arg5[%c3, %c0_22, %c0_23] : memref<4x16x8xf32, #tpu.memory_space<vmem>>, vector<1x16x8xf32>
    %56 = vector.shape_cast %55 : vector<1x16x8xf32> to vector<16x8xf32>
    %cst_24 = arith.constant dense<0.000000e+00> : vector<128x8xf32>
    %57 = tpu.matmul %54, %56, %cst_24 {dimension_numbers = #tpu.dot_dimension_numbers<[1], [0], [0], [1], [0, 0, 1, 1], [], []>} : vector<128x16xf32>, vector<16x8xf32>, vector<128x8xf32> -> vector<128x8xf32>
    %58 = vector.broadcast %35 : vector<1x8xf32> to vector<128x8xf32>
    %59 = arith.addf %57, %58 : vector<128x8xf32>
    %60 = tpu.concatenate %41, %47, %53, %59 in 1 : vector<128x8xf32>, vector<128x8xf32>, vector<128x8xf32>, vector<128x8xf32> -> vector<128x32xf32>
    %61 = vector.shape_cast %60 : vector<128x32xf32> to vector<1x128x32xf32>
    %c0_25 = arith.constant 0 : index
    %c0_26 = arith.constant 0 : index
    %c0_27 = arith.constant 0 : index
    %62 = vector.load %arg7[%c0_25, %c0_26, %c0_27] : memref<1x128x32xf32, #tpu.memory_space<vmem>>, vector<1x128x32xf32>
    tpu.vector_store %arg7[%c0_25, %c0_26, %c0_27], %61 {strides = array<i32>} : memref<1x128x32xf32, #tpu.memory_space<vmem>>, vector<1x128x32xf32>,
    return
  }
  func.func @transform_0(%arg0: i32, %arg1: i32) -> (i32, i32, i32, i32) {
    %c0_i32 = arith.constant 0 : i32
    %c0_i32_0 = arith.constant 0 : i32
    %c0_i32_1 = arith.constant 0 : i32
    return %arg0, %arg1, %c0_i32, %c0_i32_0 : i32, i32, i32, i32
  }
  func.func @transform_1(%arg0: i32, %arg1: i32) -> (i32, i32, i32, i32) {
    %c8_i32 = arith.constant 8 : i32
    %0 = arith.muli %arg1, %c8_i32 : i32
    %c1_i32 = arith.constant 1 : i32
    %1 = arith.subi %0, %c1_i32 : i32
    %c0_i32 = arith.constant 0 : i32
    %2 = arith.maxsi %1, %c0_i32 : i32
    %c0_i32_0 = arith.constant 0 : i32
    %c0_i32_1 = arith.constant 0 : i32
    %c0_i32_2 = arith.constant 0 : i32
    return %arg0, %2, %c0_i32_0, %c0_i32_1 : i32, i32, i32, i32
  }
  func.func @transform_2(%arg0: i32, %arg1: i32) -> (i32, i32, i32, i32) {
    %c8_i32 = arith.constant 8 : i32
    %0 = arith.muli %arg1, %c8_i32 : i32
    %c8_i32_0 = arith.constant 8 : i32
    %1 = arith.addi %0, %c8_i32_0 : i32
    %c15_i32 = arith.constant 15 : i32
    %2 = arith.minsi %1, %c15_i32 : i32
    %c0_i32 = arith.constant 0 : i32
    %c0_i32_1 = arith.constant 0 : i32
    %c0_i32_2 = arith.constant 0 : i32
    return %arg0, %2, %c0_i32, %c0_i32_1 : i32, i32, i32, i32
  }
  func.func @transform_3(%arg0: i32, %arg1: i32) -> (i32, i32, i32) {
    %c0_i32 = arith.constant 0 : i32
    %c0_i32_0 = arith.constant 0 : i32
    %c0_i32_1 = arith.constant 0 : i32
    %c0_i32_2 = arith.constant 0 : i32
    return %c0_i32, %c0_i32_0, %c0_i32_1 : i32, i32, i32
  }
  func.func @transform_4(%arg0: i32, %arg1: i32) -> (i32, i32) {
    %c0_i32 = arith.constant 0 : i32
    %c0_i32_0 = arith.constant 0 : i32
    %c0_i32_1 = arith.constant 0 : i32
    return %c0_i32, %c0_i32_0 : i32, i32
  }
  func.func @transform_5(%arg0: i32, %arg1: i32) -> (i32, i32, i32) {
    %c0_i32 = arith.constant 0 : i32
    %c0_i32_0 = arith.constant 0 : i32
    return %arg0, %arg1, %c0_i32 : i32, i32, i32
  }
}

</mosaic_0001>

<bundles_post_ra>
// kernel: upsampling_forward.1
= control target key start
LH: loop header
LB: loop body
LE: loop exit
PB: predicated region body
PF: predicated region fallthrough
CT: control target
= control target key end

     0   :  { %s2548_s18 = smov 0   ;;  %s2550_s19 = smov 0   ;;  %s3599_s0 = inlined_call_operand.vmem [shape: f32[2,16,18,4], index: 0, kind: input, shape index: {}, may-alias: {0,1,2}]   ;;  %s3600_s1 = inlined_call_operand.vmem [shape: f32[2,16,18,4], index: 1, kind: input, shape index: {}, may-alias: {0,1,2}]   ;;  %s3601_s2 = inlined_call_operand.vmem [shape: f32[2,16,18,4], index: 2, kind: input, shape index: {}, may-alias: {0,1,2}]   ;;  %s3602_s3 = inlined_call_operand.vmem [shape: f32[4,16,8], index: 3, kind: input, shape index: {}]   ;;  %s3603_s4 = inlined_call_operand.vmem [shape: f32[1,8], index: 4, kind: input, shape index: {}]   ;;  %s3604_s5 = inlined_call_operand.vmem [shape: f32[2,256,32], index: 5, kind: output, shape index: {}]  }
   0x1   :  { %s2552_s20 = smov 0   ;;  %s2554_s21 = smov 0  }
   0x2   :  { %s2556_s22 = smov 0  }
   0x3 LB: > { %s24_s23 = sadd.s32 1, %s2503_s20  ;;  %s27_s24 = sadd.s32 1, %s2507_s21  ;;  %s2511_s22 = sphi %s2556_s22, %s15_s22   ;;  %s2507_s21 = sphi %s2554_s21, %s3609_s21   ;;  %s2503_s20 = sphi %s2552_s20, %s3608_s20   ;;  %s2499_s19 = sphi %s2550_s19, %s3607_s19   ;;  %s2495_s18 = sphi %s2548_s18, %s3606_s18  }
   0x4   : > { %p25_p0 = scmp.ge.s32.totalorder %s24_s23, 2  ;;  %p2130_p1 = scmp.ge.s32.totalorder %s2511_s22, 1 }
   0x5   : > { %p273_p2 = scmp.lt.s32.totalorder %s2511_s22, 5 }
   0x6   : > { %s3611_s23 = smov (%p25_p0, %s24_s23), 0  ;;  %s3613_s24 = smov (!%p25_p0, %s27_s24), %s2507_s21 }
   0x7   : > { %p274_p3 = pnand %p2130_p1, %p273_p2  ;;  %p29_p4 = scmp.ge.s32.totalorder %s3613_s24, 2 }
   0x8   : > { %s2581_s25 = sshll.u32 (!%p274_p3), %s2495_s18, 3  ;;  %p337_p5 = scmp.lt.s32.totalorder (!%p274_p3), %s2499_s19, 1  ;;  %vm459_vm0 = vcmask (!%p274_p3), 1046528   ;;  %v781_v9 = vld [vmem:[%s3602_s3] sm:$0xff] (!%p274_p3)  ;;  %v782_v10 = vld [vmem:[%s3602_s3 + $0x8] sm:$0xff] (!%p274_p3)  ;;  %vm516_vm1 = vcmask (!%p274_p3), 1045504  }
   0x9   : > { %s3615_s24 = smov (%p29_p4, %s3613_s24), 0  ;;  %277 = sbr.rel (%p274_p3) target bundleno = 727 (0x2d7), region = 40 }
   0xa   : > { %p339_p6 = scmp.lt.s32.totalorder (!%p274_p3), %s2581_s25, 15  ;;  %s2134_s29 = sadd.s32 (!%p274_p3), 4294967295, %s2581_s25  ;;  %v2408_v14 = vpack.c.bf16 (!%p274_p3), %v782_v10, %v781_v9  ;;  %v2166_v27 = vld [vmem:[%s3602_s3 + $0x10] sm:$0xff] (!%p274_p3)  ;;  %v2167_v28 = vld [vmem:[%s3602_s3 + $0x18] sm:$0xff] (!%p274_p3)  ;;  %vm730_vm2 = vcmask (!%p274_p3), 31744   ;;  %vm747_vm3 = vcmask (!%p274_p3), 64512  }
   0xb   : > { %p349_p7 = scmp.gt.s32.totalorder (!%p274_p3), %s2134_s29, 0  ;;  %p394_p8 = scmp.gt.s32.totalorder (!%p274_p3), %s2495_s18, 0  ;;  %v2412_v29 = vpack.c.bf16 (!%p274_p3), %v2167_v28, %v2166_v27  ;;  %vm764_vm4 = vcmask (!%p274_p3), 97280   ;;  %vm789_vm5 = vcmask (!%p274_p3), 130048   ;;  %vm1951_vm6 = vcmask (!%p274_p3), 195584  }
   0xc   : > { %p2135_p9 = scmp.lt.s32.totalorder (!%p274_p3), %s2134_s29, 15  ;;  %s2513_s11 = smov (!%p274_p3), 8   ;;  %2409 = vmatprep.subr.bf16.mxu0 (!%p274_p3), %v2408_v14  ;;  %vm1968_vm7 = vcmask (!%p274_p3), 261120  }
   0xd   : > { %s2514_s15 = smov (!%p274_p3), 12   ;;  %2411 = vmatpush3.bf16.msra.mxu0 (!%p274_p3), %v2408_v14  ;;  %2413 = vmatprep.subr.bf16.mxu1 (!%p274_p3), %v2412_v29  ;;  %p404_p11 = scmp.lt.s32.totalorder (!%p274_p3), %s2495_s18, 1 }
   0xe   : > { %2415 = vmatpush3.bf16.msra.mxu1 (!%p274_p3), %v2412_v29 }
  0x10   : > { %s3617_s19 = smov (!%p337_p5, %s2499_s19), 1 }
  0x11   : > { %s340_s26 = scalar_select %p339_p6, %s2581_s25, 15 }
  0x12   : > { %s2588_s27 = smul.u32 48, %s3617_s19 }
  0x13   : > { %s2424_s28 = smul.u32 3, %s340_s26 }
  0x14   : > { %s350_s10 = scalar_select %p349_p7, %s2134_s29, 0 }
  0x15   : > { %s343_s30 = sadd.s32 %s2588_s27, %s2424_s28  ;;  %s2516_s29 = smov 16  }
  0x16   : > { %s2132_s6 = sshll.u32 %s343_s30, 3  ;;  %s3619_s10 = smov (!%p2135_p9, %s350_s10), 15 }
  0x17   : > { %s2596_s9 = scalar_lea.vmem %s3599_s0, %s2132_s6  ;;  %s2426_s14 = smul.u32 3, %s3619_s10 }
  0x18   : > { %v2599_v0 = vld [vmem:[%s2596_s9 + $0x8] sm:$0xff]  ;;  %v2602_v1 = vld [vmem:[%s2596_s9] sm:$0xff]  ;;  %v2605_v2 = vld [vmem:[%s2596_s9 + $0x10] sm:$0x3]  ;;  %s395_s12 = scalar_select %p394_p8, 1, 0 }
  0x19   : > { %636 = vrot.lane.b32.xlu0 %v2599_v0, %s2513_s11  ;;  %v466_v3 = vrot.slane %v2599_v0, 1  ;;  %634 = vrot.lane.b32.xlu1 %v2602_v1, %s2513_s11  ;;  %v465_v4 = vrot.slane %v2602_v1, 1  ;;  %v468_v5 = vrot.slane %v2605_v2, 1  ;;  %s357_s16 = sadd.s32 %s2426_s14, %s2588_s27  ;;  %s2515_s10 = smov 4   ;;  %v522_v31 = vrot.slane %v2602_v1, 2  ;;  %v2674_v33 = vld [vmem:[%s2596_s9 + $0x18] sm:$0xff] }
  0x1a   : > { %s396_s13 = scvt.s32.f32 %s395_s12  ;;  %s2140_s17 = sshll.u32 %s357_s16, 3  ;;  %v523_v32 = vrot.slane %v2599_v0, 2  ;;  %v2677_v34 = vld [vmem:[%s2596_s9 + $0x20] sm:$0xff]  ;;  %v525_v36 = vrot.slane %v2605_v2, 2  ;;  %v470_v37 = vrot.slane %v2674_v33, 1  ;;  %v527_v44 = vrot.slane %v2674_v33, 2 }
  0x1b   : > { %v2618_v6 = vsel %vm459_vm0, %v466_v3, %v468_v5  ;;  %v2621_v7 = vsel %vm459_vm0, %v465_v4, %v466_v3  ;;  %s359_s6 = scalar_lea.vmem %s3600_s1, %s2140_s17  ;;  %v471_v38 = vrot.slane %v2677_v34, 1  ;;  %v416_v41 = vld [vmem:[%s2596_s9 + $0x28] sm:$0x3]  ;;  %v528_v45 = vrot.slane %v2677_v34, 2  ;;  %v2714_v46 = vld [vmem:[%s2596_s9 + $0x30] sm:$0xff]  ;;  %v2717_v47 = vld [vmem:[%s2596_s9 + $0x38] sm:$0xff] }
  0x1c   : > { %v397_v8 = vstv %s396_s13  ;;  %v391_v11 = vld [vmem:[%s359_s6] sm:$0xff]  ;;  %v392_v12 = vld [vmem:[%s359_s6 + $0x8] sm:$0xff]  ;;  %v393_v13 = vld [vmem:[%s359_s6 + $0x10] sm:$0x3]  ;;  %v524_v35 = vsel %vm516_vm1, %v522_v31, %v523_v32  ;;  %v526_v39 = vsel %vm516_vm1, %v523_v32, %v525_v36  ;;  %v473_v42 = vrot.slane %v416_v41, 1  ;;  %s365_s12 = sadd.s32 8, %s2581_s25 }
  0x1d   : > { %684 = vrot.lane.b32.xlu0 %v2618_v6, %s2514_s15  ;;  %682 = vrot.lane.b32.xlu1 %v2621_v7, %s2514_s15  ;;  %v2639_v15 = vmul.f32 %v397_v8, %v391_v11  ;;  %v2641_v16 = vmul.f32 %v397_v8, %v392_v12  ;;  %v400_v17 = vmul.f32 %v397_v8, %v393_v13  ;;  %v530_v49 = vrot.slane %v416_v41, 2  ;;  %v419_v54 = vld [vmem:[%s2596_s9 + $0x40] sm:$0x3]  ;;  %v2753_v59 = vld [vmem:[%s2596_s9 + $0x48] sm:$0xff]  ;;  %p2955_p10 = scmp.lt.s32.totalorder %s365_s12, 15  ;;  %s2517_s30 = smov 24  }
  0x1e   : > { %v2689_v40 = vsel %vm459_vm0, %v470_v37, %v471_v38  ;;  %v2700_v43 = vsel %vm459_vm0, %v471_v38, %v473_v42  ;;  %v529_v48 = vsel %vm516_vm1, %v527_v44, %v528_v45  ;;  %v475_v50 = vrot.slane %v2714_v46, 1  ;;  %v2756_v60 = vld [vmem:[%s2596_s9 + $0x50] sm:$0xff]  ;;  %v422_v5 = vld [vmem:[%s2596_s9 + $0x58] sm:$0x3]  ;;  %v2792_v12 = vld [vmem:[%s2596_s9 + $0x60] sm:$0xff]  ;;  %s2147_s6 = sshll.u32 %s3617_s19, 5 }
  0x1f   : > { %v460_v18 = vrot.slane %v2639_v15, 1  ;;  %v461_v19 = vrot.slane %v2641_v16, 1  ;;  %v463_v20 = vrot.slane %v400_v17, 1  ;;  %v518_v21 = vrot.slane %v2641_v16, 2  ;;  %v2795_v13 = vld [vmem:[%s2596_s9 + $0x68] sm:$0xff]  ;;  %v2831_v32 = vld [vmem:[%s2596_s9 + $0x78] sm:$0xff] }
  0x20   : > { %v517_v22 = vrot.slane %v2639_v15, 2  ;;  %v520_v26 = vrot.slane %v400_v17, 2  ;;  %v476_v51 = vrot.slane %v2717_v47, 1  ;;  %v531_v52 = vsel %vm516_vm1, %v528_v45, %v530_v49  ;;  %v428_v49 = vld [vmem:[%s2596_s9 + $0x88] sm:$0x3]  ;;  %s3621_s12 = smov (!%p2955_p10, %s365_s12), 15 }
  0x21   : > { %1031 = vrot.lane.b32.xlu1 %v2621_v7, %s2513_s11  ;;  %v2650_v23 = vsel %vm459_vm0, %v460_v18, %v461_v19  ;;  %v2656_v25 = vsel %vm459_vm0, %v461_v19, %v463_v20  ;;  %v478_v55 = vrot.slane %v419_v54, 1  ;;  %v532_v57 = vrot.slane %v2714_v46, 2  ;;  %s3623_s12 = smov (!%p2955_p10, %s3621_s12), 15 }
  0x22   : > { %586 = vrot.lane.b32.xlu0 %v2650_v23, %s2515_s10  ;;  %v519_v24 = vsel %vm516_vm1, %v517_v22, %v518_v21  ;;  %v521_v30 = vsel %vm516_vm1, %v518_v21, %v520_v26  ;;  %v2728_v53 = vsel %vm459_vm0, %v475_v50, %v476_v51  ;;  %v533_v58 = vrot.slane %v2717_v47, 2  ;;  %v425_v22 = vld [vmem:[%s2596_s9 + $0x70] sm:$0x3]  ;;  %s2427_s13 = smul.u32 3, %s3623_s12 }
  0x23   : > { %v2739_v56 = vsel %vm459_vm0, %v476_v51, %v478_v55  ;;  %v535_v62 = vrot.slane %v419_v54, 2  ;;  %v480_v63 = vrot.slane %v2753_v59, 1  ;;  %v481_v2 = vrot.slane %v2756_v60, 1 }
  0x24   : > { %v534_v61 = vsel %vm516_vm1, %v532_v57, %v533_v58  ;;  %v483_v8 = vrot.slane %v422_v5, 1  ;;  %v537_v10 = vrot.slane %v2753_v59, 2  ;;  %v538_v11 = vrot.slane %v2756_v60, 2  ;;  %s374_s14 = sadd.s32 %s2427_s13, %s2588_s27 }
  0x25   : > { %1033 = vrot.lane.b32.xlu1 %v2618_v6, %s2513_s11  ;;  %v536_v3 = vsel %vm516_vm1, %v533_v58, %v535_v62  ;;  %v2767_v4 = vsel %vm459_vm0, %v480_v63, %v481_v2  ;;  %v540_v17 = vrot.slane %v422_v5, 2  ;;  %v485_v18 = vrot.slane %v2792_v12, 1  ;;  %s2145_s16 = sshll.u32 %s374_s14, 3 }
  0x26   : > { %588 = vrot.lane.b32.xlu0 %v2656_v25, %s2515_s10  ;;  %v2778_v9 = vsel %vm459_vm0, %v481_v2, %v483_v8  ;;  %v539_v14 = vsel %vm516_vm1, %v537_v10, %v538_v11  ;;  %v486_v19 = vrot.slane %v2795_v13, 1  ;;  %v542_v28 = vrot.slane %v2792_v12, 2  ;;  %s3034_s28 = scalar_lea.vmem %s3601_s2, %s2145_s16 }
  0x27   : > { %v541_v20 = vsel %vm516_vm1, %v538_v11, %v540_v17  ;;  %v543_v29 = vrot.slane %v2795_v13, 2  ;;  %v545_v37 = vrot.slane %v425_v22, 2  ;;  %v490_v38 = vrot.slane %v2831_v32, 1 }
  0x28   : > { %v2806_v21 = vsel %vm459_vm0, %v485_v18, %v486_v19  ;;  %v547_v8 = vrot.slane %v2831_v32, 2 }
  0x29   : > { %983 = vrot.lane.b32.xlu1 %v519_v24, %s2515_s10  ;;  %v488_v24 = vrot.slane %v425_v22, 1  ;;  %v544_v36 = vsel %vm516_vm1, %v542_v28, %v543_v29  ;;  %v546_v44 = vsel %vm516_vm1, %v543_v29, %v545_v37 }
  0x2a   : > { %985 = vrot.lane.b32.xlu0 %v521_v30, %s2515_s10 }
  0x2b   : > { %v2817_v26 = vsel %vm459_vm0, %v486_v19, %v488_v24  ;;  %v2887_v19 = vld [vmem:[%s2596_s9 + $0x90] sm:$0xff]  ;;  %v550_v24 = vrot.slane %v428_v49, 2 }
  0x2c   : > { %v495_v29 = vrot.slane %v2887_v19, 1 }
  0x2d   : > { %590 = vrot.lane.b32.xlu1 %v2621_v7, %s2515_s10 }
  0x2e   : > { %1079 = vrot.lane.b32.xlu0 %v524_v35, %s2514_s15 }
  0x31   : > { %592 = vrot.lane.b32.xlu1 %v2618_v6, %s2515_s10 }
  0x32   : > { %1081 = vrot.lane.b32.xlu0 %v526_v39, %s2514_s15 }
  0x35   : > { %987 = vrot.lane.b32.xlu1 %v524_v35, %s2515_s10  ;;  %v2834_v35 = vld [vmem:[%s2596_s9 + $0x80] sm:$0xff] }
  0x36   : > { %638 = vrot.lane.b32.xlu0 %v2674_v33, %s2513_s11  ;;  %v548_v10 = vrot.slane %v2834_v35, 2 }
  0x38   : > { %v549_v22 = vsel %vm516_vm1, %v547_v8, %v548_v10 }
  0x39   : > { %686 = vrot.lane.b32.xlu1 %v2689_v40, %s2514_s15 }
  0x3a   : > { %640 = vrot.lane.b32.xlu0 %v2677_v34, %s2513_s11 }
  0x3d   : > { %1035 = vrot.lane.b32.xlu1 %v2689_v40, %s2513_s11 }
  0x3e   : > { %989 = vrot.lane.b32.xlu0 %v526_v39, %s2515_s10  ;;  %v491_v39 = vrot.slane %v2834_v35, 1 }
  0x40   : > { %v2845_v45 = vsel %vm459_vm0, %v490_v38, %v491_v39 }
  0x41   : > { %1037 = vrot.lane.b32.xlu1 %v2700_v43, %s2513_s11 }
  0x42   : > { %688 = vrot.lane.b32.xlu0 %v2700_v43, %s2514_s15 }
  0x45   : > { %594 = vrot.lane.b32.xlu1 %v2689_v40, %s2515_s10 }
  0x46   : > { %1083 = vrot.lane.b32.xlu0 %v529_v48, %s2514_s15 }
  0x49   : > { %596 = vrot.lane.b32.xlu1 %v2700_v43, %s2515_s10 }
  0x4a   : > { %1085 = vrot.lane.b32.xlu0 %v531_v52, %s2514_s15 }
  0x4d   : > { %991 = vrot.lane.b32.xlu1 %v529_v48, %s2515_s10 }
  0x4e   : > { %642 = vrot.lane.b32.xlu0 %v2714_v46, %s2513_s11 }
  0x51   : > { %690 = vrot.lane.b32.xlu1 %v2728_v53, %s2514_s15 }
  0x52   : > { %644 = vrot.lane.b32.xlu0 %v2717_v47, %s2513_s11 }
  0x55   : > { %1039 = vrot.lane.b32.xlu1 %v2728_v53, %s2513_s11 }
  0x56   : > { %993 = vrot.lane.b32.xlu0 %v531_v52, %s2515_s10  ;;  %v493_v52 = vrot.slane %v428_v49, 1 }
  0x59   : > { %1041 = vrot.lane.b32.xlu1 %v2739_v56, %s2513_s11 }
  0x5a   : > { %692 = vrot.lane.b32.xlu0 %v2739_v56, %s2514_s15 }
  0x5d   : > { %598 = vrot.lane.b32.xlu1 %v2728_v53, %s2515_s10 }
  0x5e   : > { %1087 = vrot.lane.b32.xlu0 %v534_v61, %s2514_s15 }
  0x61   : > { %600 = vrot.lane.b32.xlu1 %v2739_v56, %s2515_s10 }
  0x62   : > { %1089 = vrot.lane.b32.xlu0 %v536_v3, %s2514_s15 }
  0x65   : > { %995 = vrot.lane.b32.xlu1 %v534_v61, %s2515_s10 }
  0x66   : > { %646 = vrot.lane.b32.xlu0 %v2753_v59, %s2513_s11 }
  0x69   : > { %694 = vrot.lane.b32.xlu1 %v2767_v4, %s2514_s15 }
  0x6a   : > { %648 = vrot.lane.b32.xlu0 %v2756_v60, %s2513_s11 }
  0x6d   : > { %1043 = vrot.lane.b32.xlu1 %v2767_v4, %s2513_s11 }
  0x6e   : > { %997 = vrot.lane.b32.xlu0 %v536_v3, %s2515_s10 }
  0x71   : > { %1045 = vrot.lane.b32.xlu1 %v2778_v9, %s2513_s11 }
  0x72   : > { %696 = vrot.lane.b32.xlu0 %v2778_v9, %s2514_s15 }
  0x75   : > { %602 = vrot.lane.b32.xlu1 %v2767_v4, %s2515_s10 }
  0x76   : > { %1091 = vrot.lane.b32.xlu0 %v539_v14, %s2514_s15 }
  0x79   : > { %604 = vrot.lane.b32.xlu1 %v2778_v9, %s2515_s10 }
  0x7a   : > { %1093 = vrot.lane.b32.xlu0 %v541_v20, %s2514_s15 }
  0x7d   : > { %999 = vrot.lane.b32.xlu1 %v539_v14, %s2515_s10 }
  0x7e   : > { %650 = vrot.lane.b32.xlu0 %v2792_v12, %s2513_s11 }
  0x81   : > { %698 = vrot.lane.b32.xlu1 %v2806_v21, %s2514_s15 }
  0x82   : > { %652 = vrot.lane.b32.xlu0 %v2795_v13, %s2513_s11 }
  0x85   : > { %1047 = vrot.lane.b32.xlu1 %v2806_v21, %s2513_s11 }
  0x86   : > { %1001 = vrot.lane.b32.xlu0 %v541_v20, %s2515_s10  ;;  %v2890_v20 = vld [vmem:[%s2596_s9 + $0x98] sm:$0xff] }
  0x89   : > { %1049 = vrot.lane.b32.xlu1 %v2817_v26, %s2513_s11 }
  0x8a   : > { %700 = vrot.lane.b32.xlu0 %v2817_v26, %s2514_s15 }
  0x8b   : > { %v635_v27 = vpop.permute.xlu1 %634  ;;  %v637_v30 = vpop.permute.xlu0 %636 }
  0x8d   : > { %606 = vrot.lane.b32.xlu1 %v2806_v21, %s2515_s10 }
  0x8e   : > { %1095 = vrot.lane.b32.xlu0 %v544_v36, %s2514_s15 }
  0x8f   : > { %v683_v31 = vpop.permute.xlu1 %682  ;;  %v685_v41 = vpop.permute.xlu0 %684 }
  0x91   : > { %608 = vrot.lane.b32.xlu1 %v2817_v26, %s2515_s10 }
  0x92   : > { %1097 = vrot.lane.b32.xlu0 %v546_v44, %s2514_s15 }
  0x93   : > { %v1032_v42 = vpop.permute.xlu1 %1031 }
  0x94   : > { %v587_v50 = vpop.permute.xlu0 %586 }
  0x95   : > { %1003 = vrot.lane.b32.xlu1 %v544_v36, %s2515_s10  ;;  %v731_v51 = vsel %vm730_vm2, %v2639_v15, %v587_v50  ;;  %v2863_v15 = vsel %vm459_vm0, %v491_v39, %v493_v52  ;;  %v551_v36 = vsel %vm516_vm1, %v548_v10, %v550_v24  ;;  %v2185_v52 = vld [vmem:[%s3602_s3 + $0x28] sm:$0xff]  ;;  %v552_v10 = vrot.slane %v2887_v19, 2 }
  0x96   : > { %654 = vrot.lane.b32.xlu0 %v2831_v32, %s2513_s11  ;;  %v748_v54 = vsel %vm747_vm3, %v731_v51, %v635_v27  ;;  %v2184_v51 = vld [vmem:[%s3602_s3 + $0x20] sm:$0xff] }
  0x97   : > { %v1034_v48 = vpop.permute.xlu1 %1033  ;;  %v765_v57 = vsel %vm764_vm4, %v748_v54, %v683_v31  ;;  %v2416_v54 = vpack.c.bf16 %v2185_v52, %v2184_v51 }
  0x98   : > { %v589_v58 = vpop.permute.xlu0 %588  ;;  %2300 = vmatprep.mubr.msk.f32.mxu0 %vm789_vm5, %v765_v57 }
  0x99   : > { %702 = vrot.lane.b32.xlu1 %v2845_v45, %s2514_s15  ;;  %v732_v61 = vsel %vm730_vm2, %v2641_v16, %v589_v58  ;;  %2417 = vmatprep.subr.bf16.mxu0 %v2416_v54 }
  0x9a   : > { %v749_v62 = vsel %vm747_vm3, %v732_v61, %v637_v30  ;;  %656 = vrot.lane.b32.xlu0 %v2834_v35, %s2513_s11  ;;  %v496_v30 = vrot.slane %v2890_v20, 1  ;;  %v2202_v61 = vld [vmem:[%s3602_s3 + $0x30] sm:$0xff] }
  0x9b   : > { %v984_v55 = vpop.permute.xlu1 %983  ;;  %v766_v2 = vsel %vm764_vm4, %v749_v62, %v685_v41  ;;  %v2203_v62 = vld [vmem:[%s3602_s3 + $0x38] sm:$0xff] }
  0x9c   : > { %v986_v3 = vpop.permute.xlu0 %985  ;;  %2301 = vmatmul.mubr.msk.f32.vlgmr.msra.gmra.mrb[0].mxu0 %vm789_vm5, %v766_v2  ;;  %v1127_v16 = vsel %vm730_vm2, %v2650_v23, %v984_v55  ;;  %v2907_v41 = vsel %vm459_vm0, %v495_v29, %v496_v30  ;;  %v2420_v2 = vpack.c.bf16 %v2203_v62, %v2202_v61 }
  0x9d   : > { %1051 = vrot.lane.b32.xlu1 %v2845_v45, %s2513_s11  ;;  %v1143_v14 = vsel %vm747_vm3, %v1127_v16, %v1032_v42  ;;  %v1128_v17 = vsel %vm730_vm2, %v2656_v25, %v986_v3  ;;  %2419 = vmatpush3.bf16.msra.mxu0 %v2416_v54 }
  0x9e   : > { %1005 = vrot.lane.b32.xlu0 %v546_v44, %s2515_s10  ;;  %v1144_v28 = vsel %vm747_vm3, %v1128_v17, %v1034_v48  ;;  %v431_v48 = vld [vmem:[%s2596_s9 + $0xa0] sm:$0x3]  ;;  %2421 = vmatprep.subr.bf16.mxu1 %v2420_v2 }
  0x9f   : > { %v591_v63 = vpop.permute.xlu1 %590 }
  0xa0   : > { %v1080_v11 = vpop.permute.xlu0 %1079  ;;  %v733_v37 = vsel %vm730_vm2, %v2602_v1, %v591_v63  ;;  %v498_v1 = vrot.slane %v431_v48, 1 }
  0xa1   : > { %1053 = vrot.lane.b32.xlu1 %v2863_v15, %s2513_s11  ;;  %v1159_v18 = vsel %vm764_vm4, %v1143_v14, %v1080_v11  ;;  %v553_v11 = vrot.slane %v2890_v20, 2 }
  0xa2   : > { %704 = vrot.lane.b32.xlu0 %v2863_v15, %s2514_s15  ;;  %2328 = vmatprep.mubr.msk.f32.mxu1 %vm789_vm5, %v1159_v18  ;;  %v2929_v57 = vsel %vm459_vm0, %v496_v30, %v498_v1 }
  0xa3   : > { %v593_v5 = vpop.permute.xlu1 %592 }
  0xa4   : > { %v1082_v27 = vpop.permute.xlu0 %1081  ;;  %v734_v63 = vsel %vm730_vm2, %v2599_v0, %v593_v5 }
  0xa5   : > { %610 = vrot.lane.b32.xlu1 %v2845_v45, %s2515_s10  ;;  %v1160_v25 = vsel %vm764_vm4, %v1144_v28, %v1082_v27  ;;  %v554_v27 = vsel %vm516_vm1, %v552_v10, %v553_v11  ;;  %v555_v28 = vrot.slane %v431_v48, 2 }
  0xa6   : > { %1099 = vrot.lane.b32.xlu0 %v549_v22, %s2514_s15  ;;  %2329 = vmatmul.mubr.msk.f32.vlgmr.msra.gmra.mrb[0].mxu1 %vm789_vm5, %v1160_v25 }
  0xa7   : > { %v988_v23 = vpop.permute.xlu1 %987  ;;  %2423 = vmatpush3.bf16.msra.mxu1 %v2420_v2 }
  0xa8   : > { %v639_v38 = vpop.permute.xlu0 %638  ;;  %v1129_v5 = vsel %vm730_vm2, %v2621_v7, %v988_v23  ;;  %v2970_v23 = vld [vmem:[%s2596_s9 + $0xa8] sm:$0xff] }
  0xa9   : > { %612 = vrot.lane.b32.xlu1 %v2863_v15, %s2515_s10  ;;  %v750_v39 = vsel %vm747_vm3, %v733_v37, %v639_v38  ;;  %v556_v37 = vsel %vm516_vm1, %v553_v11, %v555_v28  ;;  %v567_v10 = vrot.slane %v2970_v23, 2 }
  0xaa   : > { %1101 = vrot.lane.b32.xlu0 %v551_v36, %s2514_s15 }
  0xab   : > { %v687_v31 = vpop.permute.xlu1 %686 }
  0xac   : > { %v2911_v42 = vsel %vm764_vm4, %v750_v39, %v687_v31  ;;  %v641_v49 = vpop.permute.xlu0 %640  ;;  %v560_v31 = vrot.slane %v2970_v23, 1 }
  0xad   : > { %1007 = vrot.lane.b32.xlu1 %v549_v22, %s2515_s10  ;;  %2303 = vmatprep.mubr.msk.f32.mxu0 %vm789_vm5, %v2911_v42  ;;  %v751_v3 = vsel %vm747_vm3, %v734_v63, %v641_v49  ;;  %v2973_v22 = vld [vmem:[%s2596_s9 + $0xb0] sm:$0xff] }
  0xae   : > { %658 = vrot.lane.b32.xlu0 %v2887_v19, %s2513_s11 }
  0xaf   : > { %v1036_v44 = vpop.permute.xlu1 %1035 }
  0xb0   : > { %v990_v55 = vpop.permute.xlu0 %989  ;;  %v1145_v14 = vsel %vm747_vm3, %v1129_v5, %v1036_v44 }
  0xb1   : > { %706 = vrot.lane.b32.xlu1 %v2907_v41, %s2514_s15  ;;  %v1130_v24 = vsel %vm730_vm2, %v2618_v6, %v990_v55 }
  0xb2   : > { %660 = vrot.lane.b32.xlu0 %v2890_v20, %s2513_s11 }
  0xb3   : > { %v1038_v50 = vpop.permute.xlu1 %1037 }
  0xb4   : > { %v689_v16 = vpop.permute.xlu0 %688  ;;  %v1146_v25 = vsel %vm747_vm3, %v1130_v24, %v1038_v50  ;;  %v434_v50 = vld [vmem:[%s2596_s9 + $0xb8] sm:$0x3]  ;;  %s405_s9 = scalar_select %p404_p11, 1, 0 }
  0xb5   : > { %1055 = vrot.lane.b32.xlu1 %v2907_v41, %s2513_s11  ;;  %v2946_v8 = vsel %vm764_vm4, %v751_v3, %v689_v16  ;;  %v563_v51 = vrot.slane %v434_v50, 1  ;;  %v570_v61 = vrot.slane %v434_v50, 2  ;;  %v403_v50 = vld [vmem:[%s3034_s28 + $0x10] sm:$0x3] }
  0xb6   : > { %1009 = vrot.lane.b32.xlu0 %v551_v36, %s2515_s10  ;;  %2304 = vmatmul.mubr.msk.f32.gmra.mrb[2].mxu0 %vm789_vm5, %v2946_v8  ;;  %v561_v36 = vrot.slane %v2973_v22, 1  ;;  %s406_s27 = scvt.s32.f32 %s405_s9 }
  0xb7   : > { %v595_v58 = vpop.permute.xlu1 %594 }
  0xb8   : > { %v1084_v17 = vpop.permute.xlu0 %1083  ;;  %v735_v38 = vsel %vm730_vm2, %v2674_v33, %v595_v58  ;;  %v2999_v48 = vsel %vm459_vm0, %v560_v31, %v561_v36  ;;  %v3017_v55 = vsel %vm459_vm0, %v561_v36, %v563_v51  ;;  %v568_v58 = vrot.slane %v2973_v22, 2 }
  0xb9   : > { %1057 = vrot.lane.b32.xlu1 %v2929_v57, %s2513_s11  ;;  %v2963_v18 = vsel %vm764_vm4, %v1145_v14, %v1084_v17  ;;  %v401_v17 = vld [vmem:[%s3034_s28] sm:$0xff]  ;;  %v407_v24 = vstv %s406_s27 }
  0xba   : > { %708 = vrot.lane.b32.xlu0 %v2929_v57, %s2514_s15  ;;  %2331 = vmatprep.mubr.msk.f32.mxu1 %vm789_vm5, %v2963_v18  ;;  %v571_v5 = vsel %vm516_vm1, %v568_v58, %v570_v61 }
  0xbb   : > { %v597_v0 = vpop.permute.xlu1 %596 }
  0xbc   : > { %v1086_v29 = vpop.permute.xlu0 %1085  ;;  %v736_v63 = vsel %vm730_vm2, %v2677_v34, %v597_v0 }
  0xbd   : > { %614 = vrot.lane.b32.xlu1 %v2907_v41, %s2515_s10  ;;  %v2984_v30 = vsel %vm764_vm4, %v1146_v25, %v1086_v29  ;;  %v569_v25 = vsel %vm516_vm1, %v567_v10, %v568_v58  ;;  %v408_v29 = vmul.f32 %v407_v24, %v401_v17  ;;  %v410_v58 = vmul.f32 %v407_v24, %v403_v50 }
  0xbe   : > { %1103 = vrot.lane.b32.xlu0 %v554_v27, %s2514_s15  ;;  %2332 = vmatmul.mubr.msk.f32.gmra.mrb[2].mxu1 %vm789_vm5, %v2984_v30 }
  0xbf   : > { %v992_v7 = vpop.permute.xlu1 %991 }
  0xc0   : > { %v643_v39 = vpop.permute.xlu0 %642  ;;  %v1131_v0 = vsel %vm730_vm2, %v2689_v40, %v992_v7 }
  0xc1   : > { %616 = vrot.lane.b32.xlu1 %v2929_v57, %s2515_s10  ;;  %v752_v44 = vsel %vm747_vm3, %v735_v38, %v643_v39  ;;  %v575_v38 = vrot.slane %v408_v29, 1 }
  0xc2   : > { %1105 = vrot.lane.b32.xlu0 %v556_v37, %s2514_s15 }
  0xc3   : > { %v691_v6 = vpop.permute.xlu1 %690 }
  0xc4   : > { %v3003_v49 = vsel %vm764_vm4, %v752_v44, %v691_v6  ;;  %v645_v33 = vpop.permute.xlu0 %644 }
  0xc5   : > { %1011 = vrot.lane.b32.xlu1 %v554_v27, %s2515_s10  ;;  %2306 = vmatprep.mubr.msk.f32.mxu0 %vm789_vm5, %v3003_v49  ;;  %v753_v2 = vsel %vm747_vm3, %v736_v63, %v645_v33  ;;  %v402_v27 = vld [vmem:[%s3034_s28 + $0x8] sm:$0xff] }
  0xc6   : > { %662 = vrot.lane.b32.xlu0 %v2970_v23, %s2513_s11  ;;  %v409_v31 = vmul.f32 %v407_v24, %v402_v27 }
  0xc7   : > { %v1040_v1 = vpop.permute.xlu1 %1039 }
  0xc8   : > { %v994_v54 = vpop.permute.xlu0 %993  ;;  %v1147_v11 = vsel %vm747_vm3, %v1131_v0, %v1040_v1  ;;  %v576_v39 = vrot.slane %v409_v31, 1 }
  0xc9   : > { %710 = vrot.lane.b32.xlu1 %v2999_v48, %s2514_s15  ;;  %v1132_v7 = vsel %vm730_vm2, %v2700_v43, %v994_v54 }
  0xca   : > { %664 = vrot.lane.b32.xlu0 %v2973_v22, %s2513_s11  ;;  %v577_v51 = vsel %vm459_vm0, %v575_v38, %v576_v39 }
  0xcb   : > { %v1042_v52 = vpop.permute.xlu1 %1041 }
  0xcc   : > { %v693_v3 = vpop.permute.xlu0 %692  ;;  %v1148_v36 = vsel %vm747_vm3, %v1132_v7, %v1042_v52 }
  0xcd   : > { %1059 = vrot.lane.b32.xlu1 %v2999_v48, %s2513_s11  ;;  %v3028_v16 = vsel %vm764_vm4, %v753_v2, %v693_v3  ;;  %v583_v2 = vrot.slane %v410_v58, 2 }
  0xce   : > { %1013 = vrot.lane.b32.xlu0 %v556_v37, %s2515_s10  ;;  %2307 = vmatmul.mubr.msk.f32.gmra.mrb[4].mxu0 %vm789_vm5, %v3028_v16 }
  0xcf   : > { %v599_v62 = vpop.permute.xlu1 %598 }
  0xd0   : > { %v1088_v14 = vpop.permute.xlu0 %1087  ;;  %v737_v44 = vsel %vm730_vm2, %v2714_v46, %v599_v62  ;;  %v578_v62 = vrot.slane %v410_v58, 1 }
  0xd1   : > { %1061 = vrot.lane.b32.xlu1 %v3017_v55, %s2513_s11  ;;  %v3047_v28 = vsel %vm764_vm4, %v1147_v11, %v1088_v14  ;;  %v581_v11 = vrot.slane %v409_v31, 2 }
  0xd2   : > { %712 = vrot.lane.b32.xlu0 %v3017_v55, %s2514_s15  ;;  %2334 = vmatprep.mubr.msk.f32.mxu1 %vm789_vm5, %v3047_v28  ;;  %v579_v10 = vsel %vm459_vm0, %v576_v39, %v578_v62 }
  0xd3   : > { %v601_v34 = vpop.permute.xlu1 %600  ;;  %v584_v27 = vsel %vm516_vm1, %v581_v11, %v583_v2 }
  0xd4   : > { %v1090_v6 = vpop.permute.xlu0 %1089  ;;  %v738_v0 = vsel %vm730_vm2, %v2717_v47, %v601_v34  ;;  %v580_v34 = vrot.slane %v408_v29, 2 }
  0xd5   : > { %1109 = vrot.lane.b32.xlu1 %v571_v5, %s2514_s15  ;;  %v3060_v37 = vsel %vm764_vm4, %v1148_v36, %v1090_v6 }
  0xd6   : > { %1107 = vrot.lane.b32.xlu0 %v569_v25, %s2514_s15  ;;  %2335 = vmatmul.mubr.msk.f32.gmra.mrb[4].mxu1 %vm789_vm5, %v3060_v37 }
  0xd7   : > { %v996_v40 = vpop.permute.xlu1 %995 }
  0xd8   : > { %v647_v1 = vpop.permute.xlu0 %646  ;;  %v1133_v47 = vsel %vm730_vm2, %v2728_v53, %v996_v40  ;;  %v582_v53 = vsel %vm516_vm1, %v580_v34, %v581_v11 }
  0xd9   : > { %1373 = vrot.lane.b32.xlu1 %v3017_v55, %s2515_s10  ;;  %v754_v33 = vsel %vm747_vm3, %v737_v44, %v647_v1 }
  0xda   : > { %1371 = vrot.lane.b32.xlu0 %v2999_v48, %s2515_s10 }
  0xdb   : > { %v695_v43 = vpop.permute.xlu1 %694 }
  0xdc   : > { %v3072_v52 = vsel %vm764_vm4, %v754_v33, %v695_v43  ;;  %v649_v46 = vpop.permute.xlu0 %648 }
  0xdd   : > { %1549 = vrot.lane.b32.xlu1 %v569_v25, %s2515_s10  ;;  %2309 = vmatprep.mubr.msk.f32.mxu0 %vm789_vm5, %v3072_v52  ;;  %v755_v14 = vsel %vm747_vm3, %v738_v0, %v649_v46 }
  0xde   : > { %1377 = vrot.lane.b32.xlu0 %v408_v29, %s2513_s11 }
  0xdf   : > { %v1044_v54 = vpop.permute.xlu1 %1043 }
  0xe0   : > { %v998_v63 = vpop.permute.xlu0 %997  ;;  %v1149_v25 = vsel %vm747_vm3, %v1133_v47, %v1044_v54 }
  0xe1   : > { %1383 = vrot.lane.b32.xlu1 %v577_v51, %s2514_s15 }
  0xe2   : > { %1379 = vrot.lane.b32.xlu0 %v409_v31, %s2513_s11 }
  0xe3   : > { %v1046_v61 = vpop.permute.xlu1 %1045 }
  0xe4   : > { %v697_v17 = vpop.permute.xlu0 %696 }
  0xe5   : > { %1555 = vrot.lane.b32.xlu1 %v577_v51, %s2513_s11  ;;  %v3088_v24 = vsel %vm764_vm4, %v755_v14, %v697_v17 }
  0xe6   : > { %2310 = vmatmul.mubr.msk.f32.gmra.mrb[6].mxu0 %vm789_vm5, %v3088_v24  ;;  %1551 = vrot.lane.b32.xlu0 %v571_v5, %s2515_s10  ;;  %v1134_v5 = vsel %vm730_vm2, %v2739_v56, %v998_v63 }
  0xe7   : > { %v603_v3 = vpop.permute.xlu1 %602  ;;  %v1150_v40 = vsel %vm747_vm3, %v1134_v5, %v1046_v61 }
  0xe8   : > { %v1092_v31 = vpop.permute.xlu0 %1091  ;;  %v739_v43 = vsel %vm730_vm2, %v2753_v59, %v603_v3 }
  0xe9   : > { %1557 = vrot.lane.b32.xlu1 %v579_v10, %s2513_s11  ;;  %v3099_v36 = vsel %vm764_vm4, %v1149_v25, %v1092_v31 }
  0xea   : > { %2337 = vmatprep.mubr.msk.f32.mxu1 %vm789_vm5, %v3099_v36  ;;  %1385 = vrot.lane.b32.xlu0 %v579_v10, %s2514_s15 }
  0xeb   : > { %v605_v7 = vpop.permute.xlu1 %604 }
  0xec   : > { %v1094_v29 = vpop.permute.xlu0 %1093  ;;  %v740_v46 = vsel %vm730_vm2, %v2756_v60, %v605_v7 }
  0xed   : > { %1563 = vrot.lane.b32.xlu1 %v584_v27, %s2514_s15  ;;  %v3109_v38 = vsel %vm764_vm4, %v1150_v40, %v1094_v29 }
  0xee   : > { %2338 = vmatmul.mubr.msk.f32.gmra.mrb[6].mxu1 %vm789_vm5, %v3109_v38  ;;  %1561 = vrot.lane.b32.xlu0 %v582_v53, %s2514_s15 }
  0xef   : > { %v1000_v6 = vpop.permute.xlu1 %999 }
  0xf0   : > { %v651_v44 = vpop.permute.xlu0 %650  ;;  %v1135_v2 = vsel %vm730_vm2, %v2767_v4, %v1000_v6 }
  0xf1   : > { %v756_v56 = vsel %vm747_vm3, %v739_v43, %v651_v44 }
  0xf3   : > { %v699_v39 = vpop.permute.xlu1 %698 }
  0xf4   : > { %v3118_v1 = vsel %vm764_vm4, %v756_v56, %v699_v39  ;;  %v653_v33 = vpop.permute.xlu0 %652 }
  0xf5   : > { %2312 = vmatprep.mubr.msk.f32.mxu0 %vm789_vm5, %v3118_v1  ;;  %v757_v61 = vsel %vm747_vm3, %v740_v46, %v653_v33 }
  0xf7   : > { %v1048_v50 = vpop.permute.xlu1 %1047 }
  0xf8   : > { %v1002_v54 = vpop.permute.xlu0 %1001  ;;  %v1151_v3 = vsel %vm747_vm3, %v1135_v2, %v1048_v50 }
  0xf9   : > { %v1136_v11 = vsel %vm730_vm2, %v2778_v9, %v1002_v54 }
  0xfb   : > { %v1050_v51 = vpop.permute.xlu1 %1049 }
  0xfc   : > { %v701_v59 = vpop.permute.xlu0 %700  ;;  %v1152_v14 = vsel %vm747_vm3, %v1136_v11, %v1050_v51 }
  0xfd   : > { %v3126_v62 = vsel %vm764_vm4, %v757_v61, %v701_v59 }
  0xfe   : > { %2313 = vmatmul.mubr.msk.f32.gmra.mrb[8].mxu0 %vm789_vm5, %v3126_v62 }
  0xff   : > { %v607_v58 = vpop.permute.xlu1 %606 }
 0x100   : > { %v1096_v0 = vpop.permute.xlu0 %1095  ;;  %v741_v7 = vsel %vm730_vm2, %v2792_v12, %v607_v58 }
 0x101   : > { %v3134_v10 = vsel %vm764_vm4, %v1151_v3, %v1096_v0 }
 0x102   : > { %2340 = vmatprep.mubr.msk.f32.mxu1 %vm789_vm5, %v3134_v10 }
 0x103   : > { %v609_v63 = vpop.permute.xlu1 %608 }
 0x104   : > { %v1098_v17 = vpop.permute.xlu0 %1097  ;;  %v742_v40 = vsel %vm730_vm2, %v2795_v13, %v609_v63 }
 0x105   : > { %v3142_v27 = vsel %vm764_vm4, %v1152_v14, %v1098_v17 }
 0x106   : > { %2341 = vmatmul.mubr.msk.f32.gmra.mrb[8].mxu1 %vm789_vm5, %v3142_v27 }
 0x107   : > { %v1004_v60 = vpop.permute.xlu1 %1003 }
 0x108   : > { %v655_v47 = vpop.permute.xlu0 %654  ;;  %v1137_v44 = vsel %vm730_vm2, %v2806_v21, %v1004_v60 }
 0x109   : > { %v758_v34 = vsel %vm747_vm3, %v741_v7, %v655_v47 }
 0x10b   : > { %v703_v4 = vpop.permute.xlu1 %702 }
 0x10c   : > { %v3150_v25 = vsel %vm764_vm4, %v758_v34, %v703_v4  ;;  %v657_v31 = vpop.permute.xlu0 %656 }
 0x10d   : > { %2315 = vmatprep.mubr.msk.f32.mxu0 %vm789_vm5, %v3150_v25  ;;  %v759_v29 = vsel %vm747_vm3, %v742_v40, %v657_v31 }
 0x10f   : > { %v1052_v9 = vpop.permute.xlu1 %1051 }
 0x110   : > { %v1006_v5 = vpop.permute.xlu0 %1005  ;;  %v1153_v56 = vsel %vm747_vm3, %v1137_v44, %v1052_v9 }
 0x111   : > { %v1138_v51 = vsel %vm730_vm2, %v2817_v26, %v1006_v5 }
 0x113   : > { %v1054_v6 = vpop.permute.xlu1 %1053 }
 0x114   : > { %v705_v12 = vpop.permute.xlu0 %704  ;;  %v1154_v54 = vsel %vm747_vm3, %v1138_v51, %v1054_v6 }
 0x115   : > { %v3158_v39 = vsel %vm764_vm4, %v759_v29, %v705_v12 }
 0x116   : > { %2316 = vmatmul.mubr.msk.f32.gmra.mrb[10].mxu0 %vm789_vm5, %v3158_v39 }
 0x117   : > { %v611_v53 = vpop.permute.xlu1 %610 }
 0x118   : > { %v1100_v50 = vpop.permute.xlu0 %1099  ;;  %v743_v61 = vsel %vm730_vm2, %v2831_v32, %v611_v53 }
 0x119   : > { %v3166_v33 = vsel %vm764_vm4, %v1153_v56, %v1100_v50 }
 0x11a   : > { %2343 = vmatprep.mubr.msk.f32.mxu1 %vm789_vm5, %v3166_v33 }
 0x11b   : > { %v613_v43 = vpop.permute.xlu1 %612 }
 0x11c   : > { %v1102_v58 = vpop.permute.xlu0 %1101  ;;  %v744_v14 = vsel %vm730_vm2, %v2834_v35, %v613_v43 }
 0x11d   : > { %v3174_v46 = vsel %vm764_vm4, %v1154_v54, %v1102_v58 }
 0x11e   : > { %2344 = vmatmul.mubr.msk.f32.gmra.mrb[10].mxu1 %vm789_vm5, %v3174_v46 }
 0x11f   : > { %v1008_v13 = vpop.permute.xlu1 %1007 }
 0x120   : > { %v659_v59 = vpop.permute.xlu0 %658  ;;  %v1139_v47 = vsel %vm730_vm2, %v2845_v45, %v1008_v13 }
 0x121   : > { %v760_v63 = vsel %vm747_vm3, %v743_v61, %v659_v59 }
 0x123   : > { %v707_v21 = vpop.permute.xlu1 %706 }
 0x124   : > { %v3182_v2 = vsel %vm764_vm4, %v760_v63, %v707_v21  ;;  %v661_v3 = vpop.permute.xlu0 %660 }
 0x125   : > { %2318 = vmatprep.mubr.msk.f32.mxu0 %vm789_vm5, %v3182_v2  ;;  %v761_v17 = vsel %vm747_vm3, %v744_v14, %v661_v3 }
 0x127   : > { %v1056_v26 = vpop.permute.xlu1 %1055 }
 0x128   : > { %v1010_v60 = vpop.permute.xlu0 %1009  ;;  %v1155_v34 = vsel %vm747_vm3, %v1139_v47, %v1056_v26 }
 0x129   : > { %v1140_v6 = vsel %vm730_vm2, %v2863_v15, %v1010_v60 }
 0x12b   : > { %v1058_v0 = vpop.permute.xlu1 %1057 }
 0x12c   : > { %v709_v32 = vpop.permute.xlu0 %708  ;;  %v1156_v5 = vsel %vm747_vm3, %v1140_v6, %v1058_v0 }
 0x12d   : > { %v3190_v4 = vsel %vm764_vm4, %v761_v17, %v709_v32 }
 0x12e   : > { %2319 = vmatmul.mubr.msk.f32.gmra.mrb[12].mxu0 %vm789_vm5, %v3190_v4 }
 0x12f   : > { %v615_v11 = vpop.permute.xlu1 %614 }
 0x130   : > { %v1104_v9 = vpop.permute.xlu0 %1103  ;;  %v745_v29 = vsel %vm730_vm2, %v2887_v19, %v615_v11 }
 0x131   : > { %v3198_v31 = vsel %vm764_vm4, %v1155_v34, %v1104_v9 }
 0x132   : > { %2346 = vmatprep.mubr.msk.f32.mxu1 %vm789_vm5, %v3198_v31 }
 0x133   : > { %v617_v7 = vpop.permute.xlu1 %616 }
 0x134   : > { %v1106_v53 = vpop.permute.xlu0 %1105  ;;  %v746_v51 = vsel %vm730_vm2, %v2890_v20, %v617_v7 }
 0x135   : > { %v3206_v40 = vsel %vm764_vm4, %v1156_v5, %v1106_v53 }
 0x136   : > { %2347 = vmatmul.mubr.msk.f32.gmra.mrb[12].mxu1 %vm789_vm5, %v3206_v40 }
 0x137   : > { %v1012_v35 = vpop.permute.xlu1 %1011 }
 0x138   : > { %v663_v12 = vpop.permute.xlu0 %662  ;;  %v1141_v59 = vsel %vm730_vm2, %v2907_v41, %v1012_v35 }
 0x139   : > { %v762_v43 = vsel %vm747_vm3, %v745_v29, %v663_v12 }
 0x13b   : > { %v711_v45 = vpop.permute.xlu1 %710 }
 0x13c   : > { %v779_v44 = vsel %vm764_vm4, %v762_v43, %v711_v45  ;;  %v665_v15 = vpop.permute.xlu0 %664 }
 0x13d   : > { %2321 = vmatprep.mubr.msk.f32.mxu0 %vm789_vm5, %v779_v44  ;;  %v763_v58 = vsel %vm747_vm3, %v746_v51, %v665_v15 }
 0x13f   : > { %v1060_v56 = vpop.permute.xlu1 %1059 }
 0x140   : > { %v1014_v13 = vpop.permute.xlu0 %1013  ;;  %v1157_v26 = vsel %vm747_vm3, %v1141_v59, %v1060_v56 }
 0x141   : > { %v1142_v61 = vsel %vm730_vm2, %v2929_v57, %v1014_v13 }
 0x143   : > { %v1062_v50 = vpop.permute.xlu1 %1061 }
 0x144   : > { %v713_v21 = vpop.permute.xlu0 %712  ;;  %v1158_v63 = vsel %vm747_vm3, %v1142_v61, %v1062_v50 }
 0x145   : > { %v780_v19 = vsel %vm764_vm4, %v763_v58, %v713_v21 }
 0x146   : > { %2322 = vmatmul.mubr.msk.f32.gmra.mrb[14].mxu0 %vm789_vm5, %v780_v19 }
 0x147   : > { %v1110_v54 = vpop.permute.xlu1 %1109  ;;  %2356 = vmatprep.mubr.msk.f32.mxu0 %vm789_vm5, %v2911_v42 }
 0x148   : > { %v1108_v3 = vpop.permute.xlu0 %1107  ;;  %v1174_v0 = vsel %vm764_vm4, %v1158_v63, %v1110_v54 }
 0x149   : > { %v1173_v60 = vsel %vm764_vm4, %v1157_v26, %v1108_v3 }
 0x14a   : > { %2349 = vmatprep.mubr.msk.f32.mxu1 %vm789_vm5, %v1173_v60  ;;  %2357 = vmatmul.mubr.msk.f32.vlgmr.msra.gmra.mrb[16].mxu0 %vm789_vm5, %v2946_v8 }
 0x14b   : > { %v1374_v20 = vpop.permute.xlu1 %1373  ;;  %2350 = vmatmul.mubr.msk.f32.gmra.mrb[14].mxu1 %vm789_vm5, %v1174_v0  ;;  %2359 = vmatprep.mubr.msk.f32.mxu0 %vm789_vm5, %v3003_v49 }
 0x14c   : > { %2384 = vmatprep.mubr.msk.f32.mxu1 %vm789_vm5, %v2963_v18  ;;  %v1372_v41 = vpop.permute.xlu0 %1371 }
 0x14e   : > { %2360 = vmatmul.mubr.msk.f32.gmra.mrb[18].mxu0 %vm789_vm5, %v3028_v16  ;;  %v1389_v16 = vsel %vm730_vm2, %v2970_v23, %v1372_v41 }
 0x14f   : > { %v1550_v42 = vpop.permute.xlu1 %1549  ;;  %2362 = vmatprep.mubr.msk.f32.mxu0 %vm789_vm5, %v3072_v52  ;;  %2385 = vmatmul.mubr.msk.f32.vlgmr.msra.gmra.mrb[16].mxu1 %vm789_vm5, %v2984_v30  ;;  %v1390_v52 = vsel %vm730_vm2, %v2973_v22, %v1374_v20 }
 0x150   : > { %2387 = vmatprep.mubr.msk.f32.mxu1 %vm789_vm5, %v3047_v28  ;;  %v1378_v57 = vpop.permute.xlu0 %1377  ;;  %v1567_v23 = vsel %vm730_vm2, %v2999_v48, %v1550_v42 }
 0x152   : > { %2363 = vmatmul.mubr.msk.f32.gmra.mrb[20].mxu0 %vm789_vm5, %v3088_v24 }
 0x153   : > { %2365 = vmatprep.mubr.msk.f32.mxu0 %vm789_vm5, %v3118_v1  ;;  %2388 = vmatmul.mubr.msk.f32.gmra.mrb[18].mxu1 %vm789_vm5, %v3060_v37  ;;  %v1384_v8 = vpop.permute.xlu1 %1383  ;;  %v1391_v37 = vsel %vm747_vm3, %v1389_v16, %v1378_v57 }
 0x154   : > { %2390 = vmatprep.mubr.msk.f32.mxu1 %vm789_vm5, %v3099_v36  ;;  %v1380_v18 = vpop.permute.xlu0 %1379 }
 0x155   : > { %v1392_v36 = vsel %vm747_vm3, %v1390_v52, %v1380_v18 }
 0x156   : > { %2366 = vmatmul.mubr.msk.f32.gmra.mrb[22].mxu0 %vm789_vm5, %v3126_v62 }
 0x157   : > { %2368 = vmatprep.mubr.msk.f32.mxu0 %vm789_vm5, %v3150_v25  ;;  %2391 = vmatmul.mubr.msk.f32.gmra.mrb[20].mxu1 %vm789_vm5, %v3109_v38  ;;  %v1556_v49 = vpop.permute.xlu1 %1555  ;;  %v1393_v38 = vsel %vm764_vm4, %v1391_v37, %v1384_v8 }
 0x158   : > { %2393 = vmatprep.mubr.msk.f32.mxu1 %vm789_vm5, %v3134_v10  ;;  %v1552_v30 = vpop.permute.xlu0 %1551  ;;  %v1569_v1 = vsel %vm747_vm3, %v1567_v23, %v1556_v49 }
 0x159   : > { %v1568_v22 = vsel %vm730_vm2, %v3017_v55, %v1552_v30 }
 0x15a   : > { %2369 = vmatmul.mubr.msk.f32.gmra.mrb[24].mxu0 %vm789_vm5, %v3158_v39 }
 0x15b   : > { %2371 = vmatprep.mubr.msk.f32.mxu0 %vm789_vm5, %v3182_v2  ;;  %2394 = vmatmul.mubr.msk.f32.gmra.mrb[22].mxu1 %vm789_vm5, %v3142_v27  ;;  %v1558_v24 = vpop.permute.xlu1 %1557 }
 0x15c   : > { %2396 = vmatprep.mubr.msk.f32.mxu1 %vm789_vm5, %v3166_v33  ;;  %v1386_v28 = vpop.permute.xlu0 %1385  ;;  %v1570_v27 = vsel %vm747_vm3, %v1568_v22, %v1558_v24 }
 0x15d   : > { %v1394_v48 = vsel %vm764_vm4, %v1392_v36, %v1386_v28 }
 0x15e   : > { %2372 = vmatmul.mubr.msk.f32.gmra.mrb[26].mxu0 %vm789_vm5, %v3190_v4 }
 0x15f   : > { %2374 = vmatprep.mubr.msk.f32.mxu0 %vm789_vm5, %v779_v44  ;;  %2397 = vmatmul.mubr.msk.f32.gmra.mrb[24].mxu1 %vm789_vm5, %v3174_v46  ;;  %v1564_v25 = vpop.permute.xlu1 %1563  ;;  %v3309_v46 = vld [vmem:[%s3603_s4] ss:$0 sm:$0xff] }
 0x160   : > { %2399 = vmatprep.mubr.msk.f32.mxu1 %vm789_vm5, %v3198_v31  ;;  %v1562_v62 = vpop.permute.xlu0 %1561  ;;  %v1572_v55 = vsel %vm764_vm4, %v1570_v27, %v1564_v25 }
 0x161   : > { %v1571_v10 = vsel %vm764_vm4, %v1569_v1, %v1562_v62 }
 0x162   : > { %2375 = vmatmul.mubr.msk.f32.gmra.mrb[28].mxu0 %vm789_vm5, %v780_v19 }
 0x163   : > { %2400 = vmatmul.mubr.msk.f32.gmra.mrb[26].mxu1 %vm789_vm5, %v3206_v40  ;;  %2377 = vmatprep.mubr.msk.f32.mxu0 %vm789_vm5, %v1393_v38 }
 0x164   : > { %2402 = vmatprep.mubr.msk.f32.mxu1 %vm789_vm5, %v1173_v60 }
 0x166   : > { %2378 = vmatmul.mubr.msk.f32.gmra.mrb[30].mxu0 %vm789_vm5, %v1394_v48 }
 0x167   : > { %2403 = vmatmul.mubr.msk.f32.gmra.mrb[28].mxu1 %vm789_vm5, %v1174_v0 }
 0x168   : > { %2405 = vmatprep.mubr.msk.f32.mxu1 %vm789_vm5, %v1571_v10 }
 0x16b   : > { %2406 = vmatmul.mubr.msk.f32.gmra.mrb[30].mxu1 %vm789_vm5, %v1572_v55 }
 0x16f   : > { %v3302_v39 = vpop.f32.mrb[0].mxu0 }
 0x170   : > { %v3304_v33 = vpop.f32.mrb[1].mxu0 }
 0x179   : > { %v2330_v2 = vpop.f32.mrb[0].mxu1 }
 0x17a   : > { %v1298_v11 = vadd.f32 %v2330_v2, %v3309_v46  ;;  %v1292_v14 = vpop.f32.mrb[1].mxu1 }
 0x17b   : > { %v1293_v17 = vadd.f32 %v3309_v46, %v1292_v14 }
 0x17c   : > { %1745 = vrot.lane.b32.xlu1 %v1298_v11, %s2513_s11 }
 0x17d   : > { %1743 = vrot.lane.b32.xlu0 %v1293_v17, %s2513_s11 }
 0x189   : > { %v3315_v32 = vpop.f32.mrb[2].mxu0 }
 0x18a   : > { %v3317_v4 = vpop.f32.mrb[3].mxu0 }
 0x191   : > { %v2333_v7 = vpop.f32.mrb[2].mxu1 }
 0x192   : > { %v1308_v47 = vadd.f32 %v2333_v7, %v3309_v46  ;;  %v1302_v34 = vpop.f32.mrb[3].mxu1 }
 0x193   : > { %v1303_v9 = vadd.f32 %v3309_v46, %v1302_v34 }
 0x194   : > { %1749 = vrot.lane.b32.xlu1 %v1308_v47, %s2513_s11 }
 0x195   : > { %1747 = vrot.lane.b32.xlu0 %v1303_v9, %s2513_s11 }
 0x1a1   : > { %v3323_v31 = vpop.f32.mrb[4].mxu0 }
 0x1a2   : > { %v3325_v35 = vpop.f32.mrb[5].mxu0 }
 0x1a9   : > { %v2336_v6 = vpop.f32.mrb[4].mxu1 }
 0x1aa   : > { %v1318_v5 = vadd.f32 %v2336_v6, %v3309_v46  ;;  %v1312_v53 = vpop.f32.mrb[5].mxu1 }
 0x1ab   : > { %v1313_v40 = vadd.f32 %v3309_v46, %v1312_v53 }
 0x1ac   : > { %1753 = vrot.lane.b32.xlu1 %v1318_v5, %s2513_s11 }
 0x1ad   : > { %1751 = vrot.lane.b32.xlu0 %v1313_v40, %s2513_s11 }
 0x1b9   : > { %v3331_v45 = vpop.f32.mrb[6].mxu0 }
 0x1ba   : > { %v3333_v29 = vpop.f32.mrb[7].mxu0 }
 0x1c1   : > { %v2339_v12 = vpop.f32.mrb[6].mxu1 }
 0x1c2   : > { %v1328_v43 = vadd.f32 %v2339_v12, %v3309_v46  ;;  %v1322_v44 = vpop.f32.mrb[7].mxu1 }
 0x1c3   : > { %v1323_v56 = vadd.f32 %v3309_v46, %v1322_v44 }
 0x1c4   : > { %1757 = vrot.lane.b32.xlu1 %v1328_v43, %s2513_s11 }
 0x1c5   : > { %1755 = vrot.lane.b32.xlu0 %v1323_v56, %s2513_s11 }
 0x1d1   : > { %v3339_v15 = vpop.f32.mrb[8].mxu0 }
 0x1d2   : > { %v3341_v50 = vpop.f32.mrb[9].mxu0 }
 0x1d9   : > { %v2342_v13 = vpop.f32.mrb[8].mxu1 }
 0x1da   : > { %v1338_v51 = vadd.f32 %v2342_v13, %v3309_v46  ;;  %v1332_v54 = vpop.f32.mrb[9].mxu1 }
 0x1db   : > { %v1333_v58 = vadd.f32 %v3309_v46, %v1332_v54 }
 0x1dc   : > { %1761 = vrot.lane.b32.xlu1 %v1338_v51, %s2513_s11 }
 0x1dd   : > { %1759 = vrot.lane.b32.xlu0 %v1333_v58, %s2513_s11 }
 0x1e9   : > { %v3347_v21 = vpop.f32.mrb[10].mxu0 }
 0x1ea   : > { %v3349_v19 = vpop.f32.mrb[11].mxu0 }
 0x1f1   : > { %v2345_v61 = vpop.f32.mrb[10].mxu1 }
 0x1f2   : > { %v1348_v59 = vadd.f32 %v2345_v61, %v3309_v46  ;;  %v1342_v63 = vpop.f32.mrb[11].mxu1 }
 0x1f3   : > { %v1343_v20 = vadd.f32 %v3309_v46, %v1342_v63 }
 0x1f4   : > { %1765 = vrot.lane.b32.xlu1 %v1348_v59, %s2513_s11 }
 0x1f5   : > { %1763 = vrot.lane.b32.xlu0 %v1343_v20, %s2513_s11 }
 0x201   : > { %v3355_v26 = vpop.f32.mrb[12].mxu0 }
 0x202   : > { %v3357_v3 = vpop.f32.mrb[13].mxu0 }
 0x209   : > { %v2348_v0 = vpop.f32.mrb[12].mxu1 }
 0x20a   : > { %v1358_v60 = vadd.f32 %v2348_v0, %v3309_v46  ;;  %v1352_v41 = vpop.f32.mrb[13].mxu1 }
 0x20b   : > { %v1353_v42 = vadd.f32 %v3309_v46, %v1352_v41 }
 0x20c   : > { %1769 = vrot.lane.b32.xlu1 %v1358_v60, %s2513_s11 }
 0x20d   : > { %1767 = vrot.lane.b32.xlu0 %v1353_v42, %s2513_s11 }
 0x219   : > { %v3363_v57 = vpop.f32.mrb[14].mxu0 }
 0x21a   : > { %v3365_v8 = vpop.f32.mrb[15].mxu0 }
 0x21d   : > { %v2358_v18 = vpop.f32.mrb[16].mxu0 }
 0x21e   : > { %v2351_v30 = vpop.f32.mrb[14].mxu1  ;;  %v1470_v49 = vpop.f32.mrb[17].mxu0  ;;  %v1476_v36 = vadd.f32 %v2358_v18, %v3309_v46 }
 0x21f   : > { %v1368_v16 = vadd.f32 %v2351_v30, %v3309_v46  ;;  %v1362_v28 = vpop.f32.mrb[15].mxu1  ;;  %v1471_v22 = vadd.f32 %v3309_v46, %v1470_v49 }
 0x220   : > { %v1363_v37 = vadd.f32 %v3309_v46, %v1362_v28 }
 0x221   : > { %v2361_v52 = vpop.f32.mrb[18].mxu0  ;;  %1773 = vrot.lane.b32.xlu1 %v1368_v16, %s2513_s11 }
 0x222   : > { %v1480_v23 = vpop.f32.mrb[19].mxu0  ;;  %v2386_v24 = vpop.f32.mrb[16].mxu1  ;;  %1771 = vrot.lane.b32.xlu0 %v1363_v37, %s2513_s11  ;;  %v1486_v14 = vadd.f32 %v2361_v52, %v3309_v46  ;;  %s2146_s11 = sshll.u32 %s2495_s18, 4 }
 0x223   : > { %v1648_v38 = vpop.f32.mrb[17].mxu1  ;;  %v1654_v10 = vadd.f32 %v2386_v24, %v3309_v46  ;;  %v1481_v7 = vadd.f32 %v3309_v46, %v1480_v23  ;;  %p384_p12 = scmp.lt.s32.totalorder %s2146_s11, 31 }
 0x224   : > { %v1649_v25 = vadd.f32 %v3309_v46, %v1648_v38 }
 0x225   : > { %v2364_v1 = vpop.f32.mrb[20].mxu0  ;;  %1809 = vrot.lane.b32.xlu1 %v1476_v36, %s2516_s29  ;;  %s3625_s11 = smov (!%p384_p12, %s2146_s11), 31 }
 0x226   : > { %v1490_v62 = vpop.f32.mrb[21].mxu0  ;;  %v2389_v48 = vpop.f32.mrb[18].mxu1  ;;  %1807 = vrot.lane.b32.xlu0 %v1471_v22, %s2516_s29  ;;  %v1496_v44 = vadd.f32 %v2364_v1, %v3309_v46  ;;  %s387_s7 = sadd.s32 %s2147_s6, %s3625_s11 }
 0x227   : > { %v1658_v27 = vpop.f32.mrb[19].mxu1  ;;  %v1664_v6 = vadd.f32 %v2389_v48, %v3309_v46  ;;  %v1491_v13 = vadd.f32 %v3309_v46, %v1490_v62  ;;  %s2148_s8 = sshll.u32 %s387_s7, 3 }
 0x228   : > { %v1659_v53 = vadd.f32 %v3309_v46, %v1658_v27  ;;  %s3465_s19 = scalar_lea.vmem %s3604_s5, %s2148_s8 }
 0x229   : > { %v2367_v55 = vpop.f32.mrb[22].mxu0  ;;  %1873 = vrot.lane.b32.xlu1 %v1654_v10, %s2517_s30 }
 0x22a   : > { %v1500_v2 = vpop.f32.mrb[23].mxu0  ;;  %v2392_v11 = vpop.f32.mrb[20].mxu1  ;;  %1871 = vrot.lane.b32.xlu0 %v1649_v25, %s2517_s30  ;;  %v1506_v41 = vadd.f32 %v2367_v55, %v3309_v46 }
 0x22b   : > { %v1668_v17 = vpop.f32.mrb[21].mxu1  ;;  %v1674_v61 = vadd.f32 %v2392_v11, %v3309_v46  ;;  %v1501_v18 = vadd.f32 %v3309_v46, %v1500_v2 }
 0x22c   : > { %v1669_v63 = vadd.f32 %v3309_v46, %v1668_v17  ;;  %v1744_v17 = vpop.permute.xlu0 %1743 }
 0x22d   : > { %v2370_v47 = vpop.f32.mrb[24].mxu0  ;;  %1813 = vrot.lane.b32.xlu1 %v1486_v14, %s2516_s29  ;;  %v1746_v14 = vpop.permute.xlu1 %1745 }
 0x22e   : > { %v1510_v34 = vpop.f32.mrb[25].mxu0  ;;  %v2395_v9 = vpop.f32.mrb[22].mxu1  ;;  %1811 = vrot.lane.b32.xlu0 %v1481_v7, %s2516_s29  ;;  %v1516_v37 = vadd.f32 %v2370_v47, %v3309_v46 }
 0x22f   : > { %v1678_v5 = vpop.f32.mrb[23].mxu1  ;;  %v1684_v49 = vadd.f32 %v2395_v9, %v3309_v46  ;;  %v1511_v52 = vadd.f32 %v3309_v46, %v1510_v34 }
 0x230   : > { %v1679_v28 = vadd.f32 %v3309_v46, %v1678_v5  ;;  %v1748_v47 = vpop.permute.xlu0 %1747 }
 0x231   : > { %v2373_v40 = vpop.f32.mrb[26].mxu0  ;;  %1877 = vrot.lane.b32.xlu1 %v1664_v6, %s2517_s30  ;;  %v1750_v7 = vpop.permute.xlu1 %1749 }
 0x232   : > { %v1520_v12 = vpop.f32.mrb[27].mxu0  ;;  %v2398_v43 = vpop.f32.mrb[24].mxu1  ;;  %1875 = vrot.lane.b32.xlu0 %v1659_v53, %s2517_s30  ;;  %v1526_v36 = vadd.f32 %v2373_v40, %v3309_v46 }
 0x233   : > { %v1688_v56 = vpop.f32.mrb[25].mxu1  ;;  %v1694_v23 = vadd.f32 %v2398_v43, %v3309_v46  ;;  %v1521_v38 = vadd.f32 %v3309_v46, %v1520_v12 }
 0x234   : > { %v1689_v24 = vadd.f32 %v3309_v46, %v1688_v56  ;;  %v1752_v9 = vpop.permute.xlu0 %1751 }
 0x235   : > { %v2376_v51 = vpop.f32.mrb[28].mxu0  ;;  %1817 = vrot.lane.b32.xlu1 %v1496_v44, %s2516_s29  ;;  %v1754_v34 = vpop.permute.xlu1 %1753 }
 0x236   : > { %v1530_v54 = vpop.f32.mrb[29].mxu0  ;;  %v2401_v58 = vpop.f32.mrb[26].mxu1  ;;  %1815 = vrot.lane.b32.xlu0 %v1491_v13, %s2516_s29  ;;  %v1536_v62 = vadd.f32 %v2376_v51, %v3309_v46 }
 0x237   : > { %v1698_v59 = vpop.f32.mrb[27].mxu1  ;;  %v1704_v22 = vadd.f32 %v2401_v58, %v3309_v46  ;;  %v1531_v48 = vadd.f32 %v3309_v46, %v1530_v54  ;;  %v910_v58 = vadd.f32 %v3302_v39, %v3309_v46 }
 0x238   : > { %v1699_v1 = vadd.f32 %v3309_v46, %v1698_v59  ;;  %v3437_v5 = vpop.permute.xlu0 %1755  ;;  %v905_v59 = vadd.f32 %v3309_v46, %v3304_v33 }
 0x239   : > { %1881 = vrot.lane.b32.xlu1 %v1674_v61, %s2517_s30  ;;  %v2379_v20 = vpop.f32.mrb[30].mxu0  ;;  %v3435_v6 = vpop.permute.xlu1 %1757 }
 0x23a   : > { %v2404_v0 = vpop.f32.mrb[28].mxu1  ;;  %v1540_v60 = vpop.f32.mrb[31].mxu0  ;;  %1879 = vrot.lane.b32.xlu0 %v1669_v63, %s2517_s30  ;;  %v1546_v25 = vadd.f32 %v2379_v20, %v3309_v46  ;;  %v1920_v63 = vsel %vm747_vm3, %v910_v58, %v1746_v14  ;;  %v1919_v39 = vsel %vm747_vm3, %v905_v59, %v1744_v17  ;;  %v940_v14 = vadd.f32 %v3331_v45, %v3309_v46 }
 0x23b   : > { %v1708_v42 = vpop.f32.mrb[29].mxu1  ;;  %v1714_v10 = vadd.f32 %v2404_v0, %v3309_v46  ;;  %v1541_v55 = vadd.f32 %v3309_v46, %v1540_v60  ;;  %v950_v59 = vadd.f32 %v3339_v15, %v3309_v46 }
 0x23c   : > { %v1709_v27 = vadd.f32 %v3309_v46, %v1708_v42 }
 0x23d   : > { %1821 = vrot.lane.b32.xlu1 %v1506_v41, %s2516_s29 }
 0x23e   : > { %v2407_v30 = vpop.f32.mrb[30].mxu1  ;;  %1819 = vrot.lane.b32.xlu0 %v1501_v18, %s2516_s29 }
 0x23f   : > { %v1718_v16 = vpop.f32.mrb[31].mxu1  ;;  %v1724_v2 = vadd.f32 %v2407_v30, %v3309_v46  ;;  %v920_v30 = vadd.f32 %v3315_v32, %v3309_v46 }
 0x240   : > { %v1719_v11 = vadd.f32 %v3309_v46, %v1718_v16  ;;  %v915_v16 = vadd.f32 %v3309_v46, %v3317_v4 }
 0x241   : > { %1885 = vrot.lane.b32.xlu1 %v1684_v49, %s2517_s30 }
 0x242   : > { %1883 = vrot.lane.b32.xlu0 %v1679_v28, %s2517_s30  ;;  %v1922_v28 = vsel %vm747_vm3, %v920_v30, %v1750_v7  ;;  %v935_v7 = vadd.f32 %v3309_v46, %v3333_v29 }
 0x245   : > { %1825 = vrot.lane.b32.xlu1 %v1516_v37, %s2516_s29 }
 0x246   : > { %1823 = vrot.lane.b32.xlu0 %v1511_v52, %s2516_s29 }
 0x249   : > { %1889 = vrot.lane.b32.xlu1 %v1694_v23, %s2517_s30  ;;  %v1921_v23 = vsel %vm747_vm3, %v915_v16, %v1748_v47  ;;  %v1926_v47 = vsel %vm747_vm3, %v940_v14, %v3435_v6 }
 0x24a   : > { %1887 = vrot.lane.b32.xlu0 %v1689_v24, %s2517_s30 }
 0x24d   : > { %1829 = vrot.lane.b32.xlu1 %v1526_v36, %s2516_s29 }
 0x24e   : > { %1827 = vrot.lane.b32.xlu0 %v1521_v38, %s2516_s29  ;;  %v3439_v53 = vpop.permute.xlu1 %1761 }
 0x24f   : > { %v3441_v40 = vpop.permute.xlu0 %1759 }
 0x251   : > { %1893 = vrot.lane.b32.xlu1 %v1704_v22, %s2517_s30  ;;  %v930_v22 = vadd.f32 %v3323_v31, %v3309_v46 }
 0x252   : > { %1891 = vrot.lane.b32.xlu0 %v1699_v1, %s2517_s30 }
 0x255   : > { %1833 = vrot.lane.b32.xlu1 %v1536_v62, %s2516_s29  ;;  %v925_v62 = vadd.f32 %v3309_v46, %v3325_v35 }
 0x256   : > { %1831 = vrot.lane.b32.xlu0 %v1531_v48, %s2516_s29  ;;  %v1924_v48 = vsel %vm747_vm3, %v930_v22, %v1754_v34 }
 0x259   : > { %1897 = vrot.lane.b32.xlu1 %v1714_v10, %s2517_s30 }
 0x25a   : > { %1895 = vrot.lane.b32.xlu0 %v1709_v27, %s2517_s30 }
 0x25d   : > { %1837 = vrot.lane.b32.xlu1 %v1546_v25, %s2516_s29  ;;  %v1923_v25 = vsel %vm747_vm3, %v925_v62, %v1752_v9  ;;  %v980_v62 = vadd.f32 %v3363_v57, %v3309_v46 }
 0x25e   : > { %1835 = vrot.lane.b32.xlu0 %v1541_v55, %s2516_s29 }
 0x261   : > { %1901 = vrot.lane.b32.xlu1 %v1724_v2, %s2517_s30 }
 0x262   : > { %1899 = vrot.lane.b32.xlu0 %v1719_v11, %s2517_s30 }
 0x266   : > { %v3444_v12 = vpop.permute.xlu1 %1765 }
 0x267   : > { %v3446_v43 = vpop.permute.xlu0 %1763 }
 0x27e   : > { %v3448_v44 = vpop.permute.xlu1 %1769 }
 0x27f   : > { %v3450_v56 = vpop.permute.xlu0 %1767 }
 0x293   : > { %v3453_v13 = vpop.permute.xlu1 %1773 }
 0x294   : > { %v3455_v51 = vpop.permute.xlu0 %1771 }
 0x297   : > { %v1810_v54 = vpop.permute.xlu1 %1809 }
 0x298   : > { %v1808_v61 = vpop.permute.xlu0 %1807  ;;  %v1936_v20 = vsel %vm789_vm5, %v1920_v63, %v1810_v54  ;;  %v1925_v54 = vsel %vm747_vm3, %v935_v7, %v3437_v5  ;;  %v945_v5 = vadd.f32 %v3309_v46, %v3341_v50 }
 0x299   : > { %v1935_v33 = vsel %vm789_vm5, %v1919_v39, %v1808_v61 }
 0x29b   : > { %v1874_v0 = vpop.permute.xlu1 %1873 }
 0x29c   : > { %v1953_v60 = vsel %vm1951_vm6, %v1936_v20, %v1874_v0  ;;  %v1872_v41 = vpop.permute.xlu0 %1871  ;;  %v1928_v20 = vsel %vm747_vm3, %v950_v59, %v3439_v53 }
 0x29d   : > { %1970 = vst.msk [vmem:[%s3465_s19 + $0x8] sm:$0xff] %vm1968_vm7, %v1953_v60  ;;  %v1952_v42 = vsel %vm1951_vm6, %v1935_v33, %v1872_v41  ;;  %v1927_v60 = vsel %vm747_vm3, %v945_v5, %v3441_v40  ;;  %v955_v40 = vadd.f32 %v3309_v46, %v3349_v19 }
 0x29e   : > { %1969 = vst.msk [vmem:[%s3465_s19] sm:$0xff] %vm1968_vm7, %v1952_v42  ;;  %v960_v42 = vadd.f32 %v3347_v21, %v3309_v46 }
 0x29f   : > { %v1814_v18 = vpop.permute.xlu1 %1813 }
 0x2a0   : > { %v1812_v49 = vpop.permute.xlu0 %1811  ;;  %v1938_v37 = vsel %vm789_vm5, %v1922_v28, %v1814_v18  ;;  %v1930_v30 = vsel %vm747_vm3, %v960_v42, %v3444_v12  ;;  %v1929_v28 = vsel %vm747_vm3, %v955_v40, %v3446_v43  ;;  %v965_v43 = vadd.f32 %v3309_v46, %v3357_v3 }
 0x2a1   : > { %v1937_v36 = vsel %vm789_vm5, %v1921_v23, %v1812_v49  ;;  %v970_v23 = vadd.f32 %v3355_v26, %v3309_v46 }
 0x2a3   : > { %v1878_v52 = vpop.permute.xlu1 %1877 }
 0x2a4   : > { %v1955_v24 = vsel %vm1951_vm6, %v1938_v37, %v1878_v52  ;;  %v1876_v38 = vpop.permute.xlu0 %1875 }
 0x2a5   : > { %1972 = vst.msk [vmem:[%s3465_s19 + $0x18] sm:$0xff] %vm1968_vm7, %v1955_v24  ;;  %v1954_v32 = vsel %vm1951_vm6, %v1937_v36, %v1876_v38  ;;  %v1932_v36 = vsel %vm747_vm3, %v970_v23, %v3448_v44 }
 0x2a6   : > { %1971 = vst.msk [vmem:[%s3465_s19 + $0x10] sm:$0xff] %vm1968_vm7, %v1954_v32 }
 0x2a7   : > { %v1818_v4 = vpop.permute.xlu1 %1817 }
 0x2a8   : > { %v1816_v1 = vpop.permute.xlu0 %1815  ;;  %v1940_v10 = vsel %vm789_vm5, %v1924_v48, %v1818_v4  ;;  %v1931_v4 = vsel %vm747_vm3, %v965_v43, %v3450_v56  ;;  %v975_v56 = vadd.f32 %v3309_v46, %v3365_v8 }
 0x2a9   : > { %v1939_v2 = vsel %vm789_vm5, %v1923_v25, %v1816_v1 }
 0x2ab   : > { %v1882_v27 = vpop.permute.xlu1 %1881 }
 0x2ac   : > { %v1957_v55 = vsel %vm1951_vm6, %v1940_v10, %v1882_v27  ;;  %v1880_v11 = vpop.permute.xlu0 %1879  ;;  %v1934_v10 = vsel %vm747_vm3, %v980_v62, %v3453_v13 }
 0x2ad   : > { %1974 = vst.msk [vmem:[%s3465_s19 + $0x28] sm:$0xff] %vm1968_vm7, %v1957_v55  ;;  %v1956_v31 = vsel %vm1951_vm6, %v1939_v2, %v1880_v11  ;;  %v1933_v55 = vsel %vm747_vm3, %v975_v56, %v3455_v51 }
 0x2ae   : > { %1973 = vst.msk [vmem:[%s3465_s19 + $0x20] sm:$0xff] %vm1968_vm7, %v1956_v31 }
 0x2af   : > { %v1822_v35 = vpop.permute.xlu1 %1821 }
 0x2b0   : > { %v1820_v17 = vpop.permute.xlu0 %1819  ;;  %v1942_v34 = vsel %vm789_vm5, %v1926_v47, %v1822_v35 }
 0x2b1   : > { %v1941_v61 = vsel %vm789_vm5, %v1925_v54, %v1820_v17 }
 0x2b3   : > { %v1886_v9 = vpop.permute.xlu1 %1885 }
 0x2b4   : > { %v1959_v58 = vsel %vm1951_vm6, %v1942_v34, %v1886_v9  ;;  %v1884_v45 = vpop.permute.xlu0 %1883 }
 0x2b5   : > { %1976 = vst.msk [vmem:[%s3465_s19 + $0x38] sm:$0xff] %vm1968_vm7, %v1959_v58  ;;  %v1958_v29 = vsel %vm1951_vm6, %v1941_v61, %v1884_v45 }
 0x2b6   : > { %1975 = vst.msk [vmem:[%s3465_s19 + $0x30] sm:$0xff] %vm1968_vm7, %v1958_v29 }
 0x2b7   : > { %v1826_v6 = vpop.permute.xlu1 %1825 }
 0x2b8   : > { %v1824_v63 = vpop.permute.xlu0 %1823  ;;  %v1944_v0 = vsel %vm789_vm5, %v1928_v20, %v1826_v6 }
 0x2b9   : > { %v1943_v41 = vsel %vm789_vm5, %v1927_v60, %v1824_v63 }
 0x2bb   : > { %v1890_v39 = vpop.permute.xlu1 %1889 }
 0x2bc   : > { %v1961_v33 = vsel %vm1951_vm6, %v1944_v0, %v1890_v39  ;;  %v1888_v15 = vpop.permute.xlu0 %1887 }
 0x2bd   : > { %1978 = vst.msk [vmem:[%s3465_s19 + $0x48] sm:$0xff] %vm1968_vm7, %v1961_v33  ;;  %v1960_v50 = vsel %vm1951_vm6, %v1943_v41, %v1888_v15 }
 0x2be   : > { %1977 = vst.msk [vmem:[%s3465_s19 + $0x40] sm:$0xff] %vm1968_vm7, %v1960_v50 }
 0x2bf   : > { %v1830_v53 = vpop.permute.xlu1 %1829 }
 0x2c0   : > { %v1828_v18 = vpop.permute.xlu0 %1827  ;;  %v1946_v49 = vsel %vm789_vm5, %v1930_v30, %v1830_v53 }
 0x2c1   : > { %v1945_v52 = vsel %vm789_vm5, %v1929_v28, %v1828_v18 }
 0x2c3   : > { %v1894_v16 = vpop.permute.xlu1 %1893 }
 0x2c4   : > { %v1963_v37 = vsel %vm1951_vm6, %v1946_v49, %v1894_v16  ;;  %v1892_v21 = vpop.permute.xlu0 %1891 }
 0x2c5   : > { %1980 = vst.msk [vmem:[%s3465_s19 + $0x58] sm:$0xff] %vm1968_vm7, %v1963_v37  ;;  %v1962_v19 = vsel %vm1951_vm6, %v1945_v52, %v1892_v21 }
 0x2c6   : > { %1979 = vst.msk [vmem:[%s3465_s19 + $0x50] sm:$0xff] %vm1968_vm7, %v1962_v19 }
 0x2c7   : > { %v1834_v12 = vpop.permute.xlu1 %1833 }
 0x2c8   : > { %v1832_v24 = vpop.permute.xlu0 %1831  ;;  %v1948_v38 = vsel %vm789_vm5, %v1932_v36, %v1834_v12 }
 0x2c9   : > { %v1947_v1 = vsel %vm789_vm5, %v1931_v4, %v1832_v24 }
 0x2cb   : > { %v1898_v32 = vpop.permute.xlu1 %1897 }
 0x2cc   : > { %v1965_v22 = vsel %vm1951_vm6, %v1948_v38, %v1898_v32  ;;  %v1896_v26 = vpop.permute.xlu0 %1895 }
 0x2cd   : > { %1982 = vst.msk [vmem:[%s3465_s19 + $0x68] sm:$0xff] %vm1968_vm7, %v1965_v22  ;;  %v1964_v3 = vsel %vm1951_vm6, %v1947_v1, %v1896_v26 }
 0x2ce   : > { %1981 = vst.msk [vmem:[%s3465_s19 + $0x60] sm:$0xff] %vm1968_vm7, %v1964_v3 }
 0x2cf   : > { %v1838_v44 = vpop.permute.xlu1 %1837 }
 0x2d0   : > { %v1836_v48 = vpop.permute.xlu0 %1835  ;;  %v1950_v27 = vsel %vm789_vm5, %v1934_v10, %v1838_v44 }
 0x2d1   : > { %v1949_v11 = vsel %vm789_vm5, %v1933_v55, %v1836_v48 }
 0x2d3   : > { %v1902_v25 = vpop.permute.xlu1 %1901 }
 0x2d4   : > { %v1967_v2 = vsel %vm1951_vm6, %v1950_v27, %v1902_v25  ;;  %v1900_v57 = vpop.permute.xlu0 %1899 }
 0x2d5   : > { %1984 = vst.msk [vmem:[%s3465_s19 + $0x78] sm:$0xff] %vm1968_vm7, %v1967_v2  ;;  %v1966_v31 = vsel %vm1951_vm6, %v1949_v11, %v1900_v57 }
 0x2d6   : > { %1983 = vst.msk [vmem:[%s3465_s19 + $0x70] sm:$0xff] %vm1968_vm7, %v1966_v31 }
 0x2d7 PF: > { %s15_s22 = sadd.s32 1, %s2511_s22   ;;  %s3606_s18 = smov %s2503_s20 }
 0x2d8   : > { %p12_p13 = scmp.ge.s32.totalorder %s15_s22, 6   ;;  %s3607_s19 = smov %s2507_s21 }
 0x2d9   : > { %s3608_s20 = smov %s3611_s23  ;;  %s3609_s21 = smov %s3615_s24 }
 0x2da   :  { %14 = sbr.rel (!%p12_p13) target bundleno = 3 (0x3), region = 79 }

</bundles_post_ra>
